<compile_context>
chip_gen: v7x
topology: tpu7x:2x2x1
jax: 0.10.0
libtpu: 0.0.40
codegen_flags: <defaults>
</compile_context>

<pallas_src>
import functools
import math

import jax
import jax.numpy as jnp
import numpy as np
from jax.experimental import pallas as pl
from jax.experimental.pallas import tpu as pltpu


def _transformer_kernel(x_ref, mask_ref,
                        w_qkv_ref, b_qkv_ref,
                        w_op_ref, b_op_ref,
                        g1_ref, beta1_ref,
                        w_ff1_ref, b_ff1_ref,
                        w_ff2_ref, b_ff2_ref,
                        g2_ref, beta2_ref,
                        w_out_ref, b_out_ref,
                        out_ref,
                        h_ref):
    """One encoder layer per grid step; fc_out on the last step.

    x_ref:     (N, D)          flattened (seq*batch, d_model) input
    mask_ref:  (N, N)          additive attention mask (0 same batch / -1e30 cross batch)
    w_qkv:     (1, 3, D, D)    this layer's q/k/v projection weights (transposed)
    b_qkv:     (1, 3, 1, D)
    w_op:      (1, D, D)       attention out_proj (transposed), b_op: (1, 1, D)
    g1/beta1:  (1, 1, D)       LayerNorm1
    w_ff1:     (1, D, F) bf16  feed-forward linear1 (transposed), b_ff1: (1, 1, F) f32
    w_ff2:     (1, F, D) bf16  feed-forward linear2 (transposed), b_ff2: (1, 1, D) f32
    g2/beta2:  (1, 1, D)       LayerNorm2
    w_out:     (D, O)          fc_out (transposed), b_out: (1, O)
    out_ref:   (N, O)          output slab (written only on last grid step)
    h_ref:     (N, D) f32      persistent activation scratch
    """
    l = pl.program_id(0)
    N, D = h_ref.shape
    eps = 1e-5
    inv_sqrt_d = 1.0 / math.sqrt(D)

    @pl.when(l == 0)
    def _():
        h_ref[...] = x_ref[...]

    def layer_norm(h, gamma, beta):
        mu = jnp.mean(h, axis=-1, keepdims=True)
        c = h - mu
        var = jnp.mean(c * c, axis=-1, keepdims=True)
        return c * jax.lax.rsqrt(var + eps) * gamma + beta

    h = h_ref[...]                                                   # (N, D) f32

    # ---- self-attention (single head) on the flat slab --------------------------------
    # Three lane-aligned (N,D)@(D,D) dots: no lane-offset slicing of a fused QKV result.
    q = (jnp.dot(h, w_qkv_ref[0, 0], preferred_element_type=jnp.float32)
         + b_qkv_ref[0, 0]) * inv_sqrt_d
    k = jnp.dot(h, w_qkv_ref[0, 1], preferred_element_type=jnp.float32) + b_qkv_ref[0, 1]
    v = jnp.dot(h, w_qkv_ref[0, 2], preferred_element_type=jnp.float32) + b_qkv_ref[0, 2]

    # Block-diagonal (stride-B) mask encodes batch grouping: no (B,S,D) reshapes needed.
    scores = jnp.einsum('qd,kd->qk', q, k,
                        preferred_element_type=jnp.float32)          # (N, N)
    scores = scores + mask_ref[...]
    scores = scores - jnp.max(scores, axis=-1, keepdims=True)
    p = jnp.exp(scores)
    p = p * pl.reciprocal(jnp.sum(p, axis=-1, keepdims=True), approx=True)
    ctx = jnp.dot(p, v, preferred_element_type=jnp.float32)          # (N, D)

    attn = jnp.dot(ctx, w_op_ref[0], preferred_element_type=jnp.float32) + b_op_ref[0]
    h = layer_norm(h + attn, g1_ref[0], beta1_ref[0])

    # ---- feed-forward: linear1 -> ReLU -> linear2 (bf16 weights, f32 accumulate) ------
    ff = jnp.maximum(
        jnp.dot(h.astype(jnp.bfloat16), w_ff1_ref[0],
                preferred_element_type=jnp.float32) + b_ff1_ref[0],
        0.0)                                                         # (N, F) f32
    ff = (jnp.dot(ff.astype(jnp.bfloat16), w_ff2_ref[0],
                  preferred_element_type=jnp.float32) + b_ff2_ref[0])  # (N, D) f32

    h = layer_norm(h + ff, g2_ref[0], beta2_ref[0])
    h_ref[...] = h

    # ---- fc_out: single (N, D) @ (D, O) matmul + single lane-oriented 2D store --------
    @pl.when(l == pl.num_programs(0) - 1)
    def _():
        out_ref[...] = (jnp.dot(h, w_out_ref[...], preferred_element_type=jnp.float32)
                        + b_out_ref[...])


def _layer_spec(shape):
    """Per-layer block: tile only the leading L axis (trailing dims = full array dims)."""
    nd = len(shape)
    block = (1,) + tuple(shape[1:])
    return pl.BlockSpec(block, lambda l, _nd=nd: (l,) + (0,) * (_nd - 1))


def _const_spec(shape):
    nd = len(shape)
    return pl.BlockSpec(tuple(shape), lambda l, _nd=nd: (0,) * _nd)


@jax.jit
def transformer_forward(x, w_qkv, b_qkv, w_op, b_op, g1, beta1,
                        w_ff1, b_ff1, w_ff2, b_ff2, g2, beta2,
                        w_out, b_out):
    S, B, D = x.shape
    O = w_out.shape[1]
    L = w_qkv.shape[0]
    N = S * B

    # Contiguous flatten (free, no transpose).  Row i of the slab is (seq=i//B, batch=i%B).
    x2 = x.reshape(N, D)

    # Additive attention mask: tokens attend only within their own batch element
    # (constant-folded by XLA — depends only on static shapes).
    idx = jnp.arange(N)
    same_batch = (idx[:, None] % B) == (idx[None, :] % B)
    mask = jnp.where(same_batch, 0.0, -1e30).astype(jnp.float32)

    layer_args = (w_qkv, b_qkv, w_op, b_op, g1, beta1,
                  w_ff1, b_ff1, w_ff2, b_ff2, g2, beta2)
    const_args = (w_out, b_out)

    in_specs = ([_const_spec(x2.shape), _const_spec(mask.shape)]
                + [_layer_spec(a.shape) for a in layer_args]
                + [_const_spec(a.shape) for a in const_args])

    out = pl.pallas_call(
        _transformer_kernel,
        out_shape=jax.ShapeDtypeStruct((N, O), jnp.float32),
        grid_spec=pltpu.PrefetchScalarGridSpec(
            num_scalar_prefetch=0,
            grid=(L,),                       # layers pipelined: weight DMA overlaps compute
            in_specs=in_specs,
            out_specs=_const_spec((N, O)),
            scratch_shapes=[pltpu.VMEM((N, D), jnp.float32)],
        ),
        compiler_params=pltpu.CompilerParams(
            dimension_semantics=("arbitrary",),  # layer l+1 depends on layer l (scratch carry)
        ),
    )(x2, mask, *layer_args, *const_args)

    return out.reshape(S, B, O)              # free reshape back to (seq, batch, O)


def _reference(x, w_qkv, b_qkv, w_op, b_op, g1, beta1,
               w_ff1, b_ff1, w_ff2, b_ff2, g2, beta2, w_out, b_out):
    """Pure-JAX reference mirroring PyTorch TransformerEncoderLayer (nhead=1, eval).

    The FFN weights are stored in bf16 (kernel optimization); the reference uses the same
    bf16-rounded values and rounds the FFN matmul LHS identically, so the comparison checks
    kernel math (accumulation, ordering) rather than the deliberate quantization choice.
    """
    S, B, D = x.shape
    L = w_qkv.shape[0]
    eps = 1e-5
    hp = jax.lax.Precision.HIGHEST

    def ln(h, g, b):
        mu = jnp.mean(h, -1, keepdims=True)
        var = jnp.mean((h - mu) ** 2, -1, keepdims=True)
        return (h - mu) / jnp.sqrt(var + eps) * g + b

    def bf16_round(a):
        return a.astype(jnp.bfloat16).astype(jnp.float32)

    h = x  # (S, B, D)
    for l in range(L):
        q = (jnp.einsum('sbd,de->sbe', h, w_qkv[l, 0], precision=hp)
             + b_qkv[l, 0]) / jnp.sqrt(D)
        k = jnp.einsum('sbd,de->sbe', h, w_qkv[l, 1], precision=hp) + b_qkv[l, 1]
        v = jnp.einsum('sbd,de->sbe', h, w_qkv[l, 2], precision=hp) + b_qkv[l, 2]
        sc = jnp.einsum('qbd,kbd->bqk', q, k, precision=hp)
        p = jax.nn.softmax(sc, axis=-1)
        ctx = jnp.einsum('bqk,kbd->qbd', p, v, precision=hp)
        attn = jnp.einsum('sbd,de->sbe', ctx, w_op[l], precision=hp) + b_op[l]
        h = ln(h + attn, g1[l], beta1[l])
        ff = jax.nn.relu(jnp.einsum('sbf,fd->sbd'.replace('f', 'e')[:11], 0, 0)
                         if False else
                         jnp.einsum('sbd,df->sbf', bf16_round(h),
                                    w_ff1[l].astype(jnp.float32), precision=hp) + b_ff1[l])
        ff = jnp.einsum('sbf,fd->sbd', bf16_round(ff),
                        w_ff2[l].astype(jnp.float32), precision=hp) + b_ff2[l]
        h = ln(h + ff, g2[l], beta2[l])
    return jnp.einsum('sbd,do->sbo', h, w_out, precision=hp) + b_out


if __name__ == "__main__":
    # Model hyper-parameters consistent with the module's constructor.
    num_neurons = 32
    complexity = 2                          # number of encoder layers
    input_size = 16                         # unused by forward (kept for parity with module)
    output_size = 8
    D = max(1, num_neurons // complexity)   # d_model = neurons_per_layer = 16
    F = 2048                                # PyTorch default dim_feedforward
    L = complexity
    S, B = 8, 2                             # (seq, batch) — batch_first=False layout

    key = jax.random.PRNGKey(0)
    ks = jax.random.split(key, 16)

    def init(k, shape, scale=0.1):
        return jax.random.uniform(k, shape, jnp.float32, -1.0, 1.0) * scale

    # Parameters stored pre-transposed: kernel computes x @ W (PyTorch does x @ W.T).
    # in_proj split per projection (q/k/v) so the kernel does three lane-aligned dots.
    w_qkv = init(ks[0], (L, 3, D, D))            # attention in_proj
    b_qkv = init(ks[1], (L, 3, 1, D))
    w_op = init(ks[2], (L, D, D))                # attention out_proj
    b_op = init(ks[3], (L, 1, D))
    g1 = 1.0 + init(ks[4], (L, 1, D))            # LayerNorm1
    beta1 = init(ks[5], (L, 1, D))
    w_ff1 = init(ks[6], (L, D, F)).astype(jnp.bfloat16)   # feed-forward linear1 (bf16 storage)
    b_ff1 = init(ks[7], (L, 1, F))
    w_ff2 = init(ks[8], (L, F, D)).astype(jnp.bfloat16)   # feed-forward linear2 (bf16 storage)
    b_ff2 = init(ks[9], (L, 1, D))
    g2 = 1.0 + init(ks[10], (L, 1, D))           # LayerNorm2
    beta2 = init(ks[11], (L, 1, D))
    w_out = init(ks[12], (D, output_size))       # fc_out
    b_out = init(ks[13], (1, output_size))

    # Input: (seq, batch, d_model) — features must equal d_model per the module forward.
    x = jax.random.normal(ks[14], (S, B, D), jnp.float32)

    y = transformer_forward(x, w_qkv, b_qkv, w_op, b_op, g1, beta1,
                            w_ff1, b_ff1, w_ff2, b_ff2, g2, beta2, w_out, b_out)
    y = jax.block_until_ready(y)

    y_ref = _reference(x, w_qkv, b_qkv, w_op, b_op, g1, beta1,
                       w_ff1, b_ff1, w_ff2, b_ff2, g2, beta2, w_out, b_out)
    np.testing.assert_allclose(np.asarray(y), np.asarray(y_ref),
                               rtol=2e-3, atol=2e-3)

    print("KERNEL_OK")
</pallas_src>

<mosaic_0001>
module attributes {stable_mosaic.version = 11 : i64} {
  func.func @_transformer_kernel(%arg0: i32, %arg1: memref<16x16xf32, #tpu.memory_space<vmem>>, %arg2: memref<16x16xf32, #tpu.memory_space<vmem>>, %arg3: memref<1x3x16x16xf32, #tpu.memory_space<vmem>>, %arg4: memref<1x3x1x16xf32, #tpu.memory_space<vmem>>, %arg5: memref<1x16x16xf32, #tpu.memory_space<vmem>>, %arg6: memref<1x1x16xf32, #tpu.memory_space<vmem>>, %arg7: memref<1x1x16xf32, #tpu.memory_space<vmem>>, %arg8: memref<1x1x16xf32, #tpu.memory_space<vmem>>, %arg9: memref<1x16x2048xbf16, #tpu.memory_space<vmem>>, %arg10: memref<1x1x2048xf32, #tpu.memory_space<vmem>>, %arg11: memref<1x2048x16xbf16, #tpu.memory_space<vmem>>, %arg12: memref<1x1x16xf32, #tpu.memory_space<vmem>>, %arg13: memref<1x1x16xf32, #tpu.memory_space<vmem>>, %arg14: memref<1x1x16xf32, #tpu.memory_space<vmem>>, %arg15: memref<16x8xf32, #tpu.memory_space<vmem>>, %arg16: memref<1x8xf32, #tpu.memory_space<vmem>>, %arg17: memref<16x8xf32, #tpu.memory_space<vmem>>, %arg18: memref<16x16xf32, #tpu.memory_space<vmem>>) attributes {dimension_semantics = [#tpu.dimension_semantics<arbitrary>], iteration_bounds = array<i64: 2>, scalar_prefetch = 0 : i64, scratch_operands = 1 : i64, tpu.core_type = #tpu.core_type<tc>, window_params = [{pipeline_mode = #tpu.pipeline_mode<synchronous>, transform_indices = @transform_0, window_bounds = array<i64: 16, 16>}, {pipeline_mode = #tpu.pipeline_mode<synchronous>, transform_indices = @transform_1, window_bounds = array<i64: 16, 16>}, {transform_indices = @transform_2, window_bounds = array<i64: 1, 3, 16, 16>}, {transform_indices = @transform_3, window_bounds = array<i64: 1, 3, 1, 16>}, {transform_indices = @transform_4, window_bounds = array<i64: 1, 16, 16>}, {transform_indices = @transform_5, window_bounds = array<i64: 1, 1, 16>}, {transform_indices = @transform_6, window_bounds = array<i64: 1, 1, 16>}, {transform_indices = @transform_7, window_bounds = array<i64: 1, 1, 16>}, {transform_indices = @transform_8, window_bounds = array<i64: 1, 16, 2048>}, {transform_indices = @transform_9, window_bounds = array<i64: 1, 1, 2048>}, {transform_indices = @transform_10, window_bounds = array<i64: 1, 2048, 16>}, {transform_indices = @transform_11, window_bounds = array<i64: 1, 1, 16>}, {transform_indices = @transform_12, window_bounds = array<i64: 1, 1, 16>}, {transform_indices = @transform_13, window_bounds = array<i64: 1, 1, 16>}, {pipeline_mode = #tpu.pipeline_mode<synchronous>, transform_indices = @transform_14, window_bounds = array<i64: 16, 8>}, {pipeline_mode = #tpu.pipeline_mode<synchronous>, transform_indices = @transform_15, window_bounds = array<i64: 1, 8>}, {pipeline_mode = #tpu.pipeline_mode<synchronous>, transform_indices = @transform_16, window_bounds = array<i64: 16, 8>}]} {
    %c0_i32 = arith.constant 0 : i32
    %0 = arith.cmpi eq, %arg0, %c0_i32 : i32
    %1 = arith.extui %0 : i1 to i32
    %c0_i32_0 = arith.constant 0 : i32
    %2 = arith.cmpi ne, %1, %c0_i32_0 : i32
    scf.if %2 {
      %c0_80 = arith.constant 0 : index
      %c0_81 = arith.constant 0 : index
      %120 = vector.load %arg1[%c0_80, %c0_81] : memref<16x16xf32, #tpu.memory_space<vmem>>, vector<16x16xf32>
      %c0_82 = arith.constant 0 : index
      %c0_83 = arith.constant 0 : index
      %121 = vector.load %arg18[%c0_82, %c0_83] : memref<16x16xf32, #tpu.memory_space<vmem>>, vector<16x16xf32>
      tpu.vector_store %arg18[%c0_82, %c0_83], %120 {strides = array<i32>} : memref<16x16xf32, #tpu.memory_space<vmem>>, vector<16x16xf32>,
    } else {
    }
    %c0 = arith.constant 0 : index
    %c0_1 = arith.constant 0 : index
    %3 = vector.load %arg18[%c0, %c0_1] : memref<16x16xf32, #tpu.memory_space<vmem>>, vector<16x16xf32>
    %c0_2 = arith.constant 0 : index
    %c0_3 = arith.constant 0 : index
    %c0_4 = arith.constant 0 : index
    %c0_5 = arith.constant 0 : index
    %4 = vector.load %arg3[%c0_2, %c0_3, %c0_4, %c0_5] : memref<1x3x16x16xf32, #tpu.memory_space<vmem>>, vector<1x1x16x16xf32>
    %5 = vector.shape_cast %4 : vector<1x1x16x16xf32> to vector<16x16xf32>
    %cst = arith.constant dense<0.000000e+00> : vector<16x16xf32>
    %6 = tpu.matmul %3, %5, %cst {dimension_numbers = #tpu.dot_dimension_numbers<[1], [0], [0], [1], [0, 0, 1, 1], [], []>} : vector<16x16xf32>, vector<16x16xf32>, vector<16x16xf32> -> vector<16x16xf32>
    %c0_6 = arith.constant 0 : index
    %c0_7 = arith.constant 0 : index
    %c0_8 = arith.constant 0 : index
    %c0_9 = arith.constant 0 : index
    %7 = vector.load %arg4[%c0_6, %c0_7, %c0_8, %c0_9] : memref<1x3x1x16xf32, #tpu.memory_space<vmem>>, vector<1x1x1x16xf32>
    %8 = vector.shape_cast %7 : vector<1x1x1x16xf32> to vector<1x16xf32>
    %9 = vector.broadcast %8 : vector<1x16xf32> to vector<16x16xf32>
    %10 = arith.addf %6, %9 : vector<16x16xf32>
    %cst_10 = arith.constant 2.500000e-01 : f32
    %11 = vector.broadcast %cst_10 : f32 to vector<16x16xf32>
    %12 = arith.mulf %10, %11 : vector<16x16xf32>
    %c0_11 = arith.constant 0 : index
    %c1 = arith.constant 1 : index
    %c0_12 = arith.constant 0 : index
    %c0_13 = arith.constant 0 : index
    %13 = vector.load %arg3[%c0_11, %c1, %c0_12, %c0_13] : memref<1x3x16x16xf32, #tpu.memory_space<vmem>>, vector<1x1x16x16xf32>
    %14 = vector.shape_cast %13 : vector<1x1x16x16xf32> to vector<16x16xf32>
    %cst_14 = arith.constant dense<0.000000e+00> : vector<16x16xf32>
    %15 = tpu.matmul %3, %14, %cst_14 {dimension_numbers = #tpu.dot_dimension_numbers<[1], [0], [0], [1], [0, 0, 1, 1], [], []>} : vector<16x16xf32>, vector<16x16xf32>, vector<16x16xf32> -> vector<16x16xf32>
    %c0_15 = arith.constant 0 : index
    %c1_16 = arith.constant 1 : index
    %c0_17 = arith.constant 0 : index
    %c0_18 = arith.constant 0 : index
    %16 = vector.load %arg4[%c0_15, %c1_16, %c0_17, %c0_18] : memref<1x3x1x16xf32, #tpu.memory_space<vmem>>, vector<1x1x1x16xf32>
    %17 = vector.shape_cast %16 : vector<1x1x1x16xf32> to vector<1x16xf32>
    %18 = vector.broadcast %17 : vector<1x16xf32> to vector<16x16xf32>
    %19 = arith.addf %15, %18 : vector<16x16xf32>
    %c0_19 = arith.constant 0 : index
    %c2 = arith.constant 2 : index
    %c0_20 = arith.constant 0 : index
    %c0_21 = arith.constant 0 : index
    %20 = vector.load %arg3[%c0_19, %c2, %c0_20, %c0_21] : memref<1x3x16x16xf32, #tpu.memory_space<vmem>>, vector<1x1x16x16xf32>
    %21 = vector.shape_cast %20 : vector<1x1x16x16xf32> to vector<16x16xf32>
    %cst_22 = arith.constant dense<0.000000e+00> : vector<16x16xf32>
    %22 = tpu.matmul %3, %21, %cst_22 {dimension_numbers = #tpu.dot_dimension_numbers<[1], [0], [0], [1], [0, 0, 1, 1], [], []>} : vector<16x16xf32>, vector<16x16xf32>, vector<16x16xf32> -> vector<16x16xf32>
    %c0_23 = arith.constant 0 : index
    %c2_24 = arith.constant 2 : index
    %c0_25 = arith.constant 0 : index
    %c0_26 = arith.constant 0 : index
    %23 = vector.load %arg4[%c0_23, %c2_24, %c0_25, %c0_26] : memref<1x3x1x16xf32, #tpu.memory_space<vmem>>, vector<1x1x1x16xf32>
    %24 = vector.shape_cast %23 : vector<1x1x1x16xf32> to vector<1x16xf32>
    %25 = vector.broadcast %24 : vector<1x16xf32> to vector<16x16xf32>
    %26 = arith.addf %22, %25 : vector<16x16xf32>
    "tpu.trace_start"() <{level = 10 : i32, message = "qd,kd->qk"}> : () -> ()
    %cst_27 = arith.constant dense<0.000000e+00> : vector<16x16xf32>
    %27 = tpu.matmul %12, %19, %cst_27 {dimension_numbers = #tpu.dot_dimension_numbers<[1], [1], [0], [0], [0, 0, 1, 0], [], []>} : vector<16x16xf32>, vector<16x16xf32>, vector<16x16xf32> -> vector<16x16xf32>
    "tpu.trace_stop"() : () -> ()
    %c0_28 = arith.constant 0 : index
    %c0_29 = arith.constant 0 : index
    %28 = vector.load %arg2[%c0_28, %c0_29] : memref<16x16xf32, #tpu.memory_space<vmem>>, vector<16x16xf32>
    %29 = arith.addf %27, %28 : vector<16x16xf32>
    %cst_30 = arith.constant dense<0xFF800000> : vector<16xf32>
    %30 = vector.multi_reduction <maximumf>, %29, %cst_30 [1] : vector<16x16xf32> to vector<16xf32>
    %31 = vector.shape_cast %30 : vector<16xf32> to vector<16x1xf32>
    %32 = vector.broadcast %31 : vector<16x1xf32> to vector<16x16xf32>
    %33 = arith.subf %29, %32 : vector<16x16xf32>
    %34 = math.exp %33 : vector<16x16xf32>
    %cst_31 = arith.constant dense<0.000000e+00> : vector<16xf32>
    %35 = vector.multi_reduction <add>, %34, %cst_31 [1] : vector<16x16xf32> to vector<16xf32>
    %36 = vector.shape_cast %35 : vector<16xf32> to vector<16x1xf32>
    %37 = tpu.reciprocal %36 {approx = true} : vector<16x1xf32> -> vector<16x1xf32>
    %38 = vector.broadcast %37 : vector<16x1xf32> to vector<16x16xf32>
    %39 = arith.mulf %34, %38 : vector<16x16xf32>
    %cst_32 = arith.constant dense<0.000000e+00> : vector<16x16xf32>
    %40 = tpu.matmul %39, %26, %cst_32 {dimension_numbers = #tpu.dot_dimension_numbers<[1], [0], [0], [1], [0, 0, 1, 1], [], []>} : vector<16x16xf32>, vector<16x16xf32>, vector<16x16xf32> -> vector<16x16xf32>
    %c0_33 = arith.constant 0 : index
    %c0_34 = arith.constant 0 : index
    %c0_35 = arith.constant 0 : index
    %41 = vector.load %arg5[%c0_33, %c0_34, %c0_35] : memref<1x16x16xf32, #tpu.memory_space<vmem>>, vector<1x16x16xf32>
    %42 = vector.shape_cast %41 : vector<1x16x16xf32> to vector<16x16xf32>
    %cst_36 = arith.constant dense<0.000000e+00> : vector<16x16xf32>
    %43 = tpu.matmul %40, %42, %cst_36 {dimension_numbers = #tpu.dot_dimension_numbers<[1], [0], [0], [1], [0, 0, 1, 1], [], []>} : vector<16x16xf32>, vector<16x16xf32>, vector<16x16xf32> -> vector<16x16xf32>
    %c0_37 = arith.constant 0 : index
    %c0_38 = arith.constant 0 : index
    %c0_39 = arith.constant 0 : index
    %44 = vector.load %arg6[%c0_37, %c0_38, %c0_39] : memref<1x1x16xf32, #tpu.memory_space<vmem>>, vector<1x1x16xf32>
    %45 = vector.shape_cast %44 : vector<1x1x16xf32> to vector<1x16xf32>
    %46 = vector.broadcast %45 : vector<1x16xf32> to vector<16x16xf32>
    %47 = arith.addf %43, %46 : vector<16x16xf32>
    %48 = arith.addf %3, %47 : vector<16x16xf32>
    %c0_40 = arith.constant 0 : index
    %c0_41 = arith.constant 0 : index
    %c0_42 = arith.constant 0 : index
    %49 = vector.load %arg7[%c0_40, %c0_41, %c0_42] : memref<1x1x16xf32, #tpu.memory_space<vmem>>, vector<1x1x16xf32>
    %50 = vector.shape_cast %49 : vector<1x1x16xf32> to vector<1x16xf32>
    %c0_43 = arith.constant 0 : index
    %c0_44 = arith.constant 0 : index
    %c0_45 = arith.constant 0 : index
    %51 = vector.load %arg8[%c0_43, %c0_44, %c0_45] : memref<1x1x16xf32, #tpu.memory_space<vmem>>, vector<1x1x16xf32>
    %52 = vector.shape_cast %51 : vector<1x1x16xf32> to vector<1x16xf32>
    %cst_46 = arith.constant dense<0.000000e+00> : vector<16xf32>
    %53 = vector.multi_reduction <add>, %48, %cst_46 [1] : vector<16x16xf32> to vector<16xf32>
    %54 = vector.shape_cast %53 : vector<16xf32> to vector<16x1xf32>
    %cst_47 = arith.constant 1.600000e+01 : f32
    %55 = vector.broadcast %cst_47 : f32 to vector<16x1xf32>
    %56 = arith.divf %54, %55 : vector<16x1xf32>
    %57 = vector.broadcast %56 : vector<16x1xf32> to vector<16x16xf32>
    %58 = arith.subf %48, %57 : vector<16x16xf32>
    %59 = arith.mulf %58, %58 : vector<16x16xf32>
    %cst_48 = arith.constant dense<0.000000e+00> : vector<16xf32>
    %60 = vector.multi_reduction <add>, %59, %cst_48 [1] : vector<16x16xf32> to vector<16xf32>
    %61 = vector.shape_cast %60 : vector<16xf32> to vector<16x1xf32>
    %cst_49 = arith.constant 1.600000e+01 : f32
    %62 = vector.broadcast %cst_49 : f32 to vector<16x1xf32>
    %63 = arith.divf %61, %62 : vector<16x1xf32>
    %cst_50 = arith.constant 9.99999974E-6 : f32
    %64 = vector.broadcast %cst_50 : f32 to vector<16x1xf32>
    %65 = arith.addf %63, %64 : vector<16x1xf32>
    %66 = math.rsqrt %65 : vector<16x1xf32>
    %67 = vector.broadcast %66 : vector<16x1xf32> to vector<16x16xf32>
    %68 = arith.mulf %58, %67 : vector<16x16xf32>
    %69 = vector.broadcast %50 : vector<1x16xf32> to vector<16x16xf32>
    %70 = arith.mulf %68, %69 : vector<16x16xf32>
    %71 = vector.broadcast %52 : vector<1x16xf32> to vector<16x16xf32>
    %72 = arith.addf %70, %71 : vector<16x16xf32>
    %73 = arith.truncf %72 : vector<16x16xf32> to vector<16x16xbf16>
    %c0_51 = arith.constant 0 : index
    %c0_52 = arith.constant 0 : index
    %c0_53 = arith.constant 0 : index
    %74 = vector.load %arg9[%c0_51, %c0_52, %c0_53] : memref<1x16x2048xbf16, #tpu.memory_space<vmem>>, vector<1x16x2048xbf16>
    %75 = vector.shape_cast %74 : vector<1x16x2048xbf16> to vector<16x2048xbf16>
    %cst_54 = arith.constant dense<0.000000e+00> : vector<16x2048xf32>
    %76 = tpu.matmul %73, %75, %cst_54 {dimension_numbers = #tpu.dot_dimension_numbers<[1], [0], [0], [1], [0, 0, 1, 1], [], []>} : vector<16x16xbf16>, vector<16x2048xbf16>, vector<16x2048xf32> -> vector<16x2048xf32>
    %c0_55 = arith.constant 0 : index
    %c0_56 = arith.constant 0 : index
    %c0_57 = arith.constant 0 : index
    %77 = vector.load %arg10[%c0_55, %c0_56, %c0_57] : memref<1x1x2048xf32, #tpu.memory_space<vmem>>, vector<1x1x2048xf32>
    %78 = vector.shape_cast %77 : vector<1x1x2048xf32> to vector<1x2048xf32>
    %79 = vector.broadcast %78 : vector<1x2048xf32> to vector<16x2048xf32>
    %80 = arith.addf %76, %79 : vector<16x2048xf32>
    %cst_58 = arith.constant 0.000000e+00 : f32
    %81 = vector.broadcast %cst_58 : f32 to vector<16x2048xf32>
    %82 = arith.maximumf %80, %81 : vector<16x2048xf32>
    %83 = arith.truncf %82 : vector<16x2048xf32> to vector<16x2048xbf16>
    %c0_59 = arith.constant 0 : index
    %c0_60 = arith.constant 0 : index
    %c0_61 = arith.constant 0 : index
    %84 = vector.load %arg11[%c0_59, %c0_60, %c0_61] : memref<1x2048x16xbf16, #tpu.memory_space<vmem>>, vector<1x2048x16xbf16>
    %85 = vector.shape_cast %84 : vector<1x2048x16xbf16> to vector<2048x16xbf16>
    %cst_62 = arith.constant dense<0.000000e+00> : vector<16x16xf32>
    %86 = tpu.matmul %83, %85, %cst_62 {dimension_numbers = #tpu.dot_dimension_numbers<[1], [0], [0], [1], [0, 0, 1, 1], [], []>} : vector<16x2048xbf16>, vector<2048x16xbf16>, vector<16x16xf32> -> vector<16x16xf32>
    %c0_63 = arith.constant 0 : index
    %c0_64 = arith.constant 0 : index
    %c0_65 = arith.constant 0 : index
    %87 = vector.load %arg12[%c0_63, %c0_64, %c0_65] : memref<1x1x16xf32, #tpu.memory_space<vmem>>, vector<1x1x16xf32>
    %88 = vector.shape_cast %87 : vector<1x1x16xf32> to vector<1x16xf32>
    %89 = vector.broadcast %88 : vector<1x16xf32> to vector<16x16xf32>
    %90 = arith.addf %86, %89 : vector<16x16xf32>
    %91 = arith.addf %72, %90 : vector<16x16xf32>
    %c0_66 = arith.constant 0 : index
    %c0_67 = arith.constant 0 : index
    %c0_68 = arith.constant 0 : index
    %92 = vector.load %arg13[%c0_66, %c0_67, %c0_68] : memref<1x1x16xf32, #tpu.memory_space<vmem>>, vector<1x1x16xf32>
    %93 = vector.shape_cast %92 : vector<1x1x16xf32> to vector<1x16xf32>
    %c0_69 = arith.constant 0 : index
    %c0_70 = arith.constant 0 : index
    %c0_71 = arith.constant 0 : index
    %94 = vector.load %arg14[%c0_69, %c0_70, %c0_71] : memref<1x1x16xf32, #tpu.memory_space<vmem>>, vector<1x1x16xf32>
    %95 = vector.shape_cast %94 : vector<1x1x16xf32> to vector<1x16xf32>
    %cst_72 = arith.constant dense<0.000000e+00> : vector<16xf32>
    %96 = vector.multi_reduction <add>, %91, %cst_72 [1] : vector<16x16xf32> to vector<16xf32>
    %97 = vector.shape_cast %96 : vector<16xf32> to vector<16x1xf32>
    %cst_73 = arith.constant 1.600000e+01 : f32
    %98 = vector.broadcast %cst_73 : f32 to vector<16x1xf32>
    %99 = arith.divf %97, %98 : vector<16x1xf32>
    %100 = vector.broadcast %99 : vector<16x1xf32> to vector<16x16xf32>
    %101 = arith.subf %91, %100 : vector<16x16xf32>
    %102 = arith.mulf %101, %101 : vector<16x16xf32>
    %cst_74 = arith.constant dense<0.000000e+00> : vector<16xf32>
    %103 = vector.multi_reduction <add>, %102, %cst_74 [1] : vector<16x16xf32> to vector<16xf32>
    %104 = vector.shape_cast %103 : vector<16xf32> to vector<16x1xf32>
    %cst_75 = arith.constant 1.600000e+01 : f32
    %105 = vector.broadcast %cst_75 : f32 to vector<16x1xf32>
    %106 = arith.divf %104, %105 : vector<16x1xf32>
    %cst_76 = arith.constant 9.99999974E-6 : f32
    %107 = vector.broadcast %cst_76 : f32 to vector<16x1xf32>
    %108 = arith.addf %106, %107 : vector<16x1xf32>
    %109 = math.rsqrt %108 : vector<16x1xf32>
    %110 = vector.broadcast %109 : vector<16x1xf32> to vector<16x16xf32>
    %111 = arith.mulf %101, %110 : vector<16x16xf32>
    %112 = vector.broadcast %93 : vector<1x16xf32> to vector<16x16xf32>
    %113 = arith.mulf %111, %112 : vector<16x16xf32>
    %114 = vector.broadcast %95 : vector<1x16xf32> to vector<16x16xf32>
    %115 = arith.addf %113, %114 : vector<16x16xf32>
    %c0_77 = arith.constant 0 : index
    %c0_78 = arith.constant 0 : index
    %116 = vector.load %arg18[%c0_77, %c0_78] : memref<16x16xf32, #tpu.memory_space<vmem>>, vector<16x16xf32>
    tpu.vector_store %arg18[%c0_77, %c0_78], %115 {strides = array<i32>} : memref<16x16xf32, #tpu.memory_space<vmem>>, vector<16x16xf32>,
    %c1_i32 = arith.constant 1 : i32
    %117 = arith.cmpi eq, %arg0, %c1_i32 : i32
    %118 = arith.extui %117 : i1 to i32
    %c0_i32_79 = arith.constant 0 : i32
    %119 = arith.cmpi ne, %118, %c0_i32_79 : i32
    scf.if %119 {
      %c0_80 = arith.constant 0 : index
      %c0_81 = arith.constant 0 : index
      %120 = vector.load %arg15[%c0_80, %c0_81] : memref<16x8xf32, #tpu.memory_space<vmem>>, vector<16x8xf32>
      %cst_82 = arith.constant dense<0.000000e+00> : vector<16x8xf32>
      %121 = tpu.matmul %115, %120, %cst_82 {dimension_numbers = #tpu.dot_dimension_numbers<[1], [0], [0], [1], [0, 0, 1, 1], [], []>} : vector<16x16xf32>, vector<16x8xf32>, vector<16x8xf32> -> vector<16x8xf32>
      %c0_83 = arith.constant 0 : index
      %c0_84 = arith.constant 0 : index
      %122 = vector.load %arg16[%c0_83, %c0_84] : memref<1x8xf32, #tpu.memory_space<vmem>>, vector<1x8xf32>
      %123 = vector.broadcast %122 : vector<1x8xf32> to vector<16x8xf32>
      %124 = arith.addf %121, %123 : vector<16x8xf32>
      %c0_85 = arith.constant 0 : index
      %c0_86 = arith.constant 0 : index
      %125 = vector.load %arg17[%c0_85, %c0_86] : memref<16x8xf32, #tpu.memory_space<vmem>>, vector<16x8xf32>
      tpu.vector_store %arg17[%c0_85, %c0_86], %124 {strides = array<i32>} : memref<16x8xf32, #tpu.memory_space<vmem>>, vector<16x8xf32>,
    } else {
    }
    return
  }
  func.func @transform_0(%arg0: i32) -> (i32, i32) {
    %c0_i32 = arith.constant 0 : i32
    %c0_i32_0 = arith.constant 0 : i32
    %c0_i32_1 = arith.constant 0 : i32
    return %c0_i32, %c0_i32_0 : i32, i32
  }
  func.func @transform_1(%arg0: i32) -> (i32, i32) {
    %c0_i32 = arith.constant 0 : i32
    %c0_i32_0 = arith.constant 0 : i32
    %c0_i32_1 = arith.constant 0 : i32
    return %c0_i32, %c0_i32_0 : i32, i32
  }
  func.func @transform_2(%arg0: i32) -> (i32, i32, i32, i32) {
    %c0_i32 = arith.constant 0 : i32
    %c0_i32_0 = arith.constant 0 : i32
    %c0_i32_1 = arith.constant 0 : i32
    %c0_i32_2 = arith.constant 0 : i32
    return %arg0, %c0_i32, %c0_i32_0, %c0_i32_1 : i32, i32, i32, i32
  }
  func.func @transform_3(%arg0: i32) -> (i32, i32, i32, i32) {
    %c0_i32 = arith.constant 0 : i32
    %c0_i32_0 = arith.constant 0 : i32
    %c0_i32_1 = arith.constant 0 : i32
    %c0_i32_2 = arith.constant 0 : i32
    return %arg0, %c0_i32, %c0_i32_0, %c0_i32_1 : i32, i32, i32, i32
  }
  func.func @transform_4(%arg0: i32) -> (i32, i32, i32) {
    %c0_i32 = arith.constant 0 : i32
    %c0_i32_0 = arith.constant 0 : i32
    %c0_i32_1 = arith.constant 0 : i32
    return %arg0, %c0_i32, %c0_i32_0 : i32, i32, i32
  }
  func.func @transform_5(%arg0: i32) -> (i32, i32, i32) {
    %c0_i32 = arith.constant 0 : i32
    %c0_i32_0 = arith.constant 0 : i32
    %c0_i32_1 = arith.constant 0 : i32
    return %arg0, %c0_i32, %c0_i32_0 : i32, i32, i32
  }
  func.func @transform_6(%arg0: i32) -> (i32, i32, i32) {
    %c0_i32 = arith.constant 0 : i32
    %c0_i32_0 = arith.constant 0 : i32
    %c0_i32_1 = arith.constant 0 : i32
    return %arg0, %c0_i32, %c0_i32_0 : i32, i32, i32
  }
  func.func @transform_7(%arg0: i32) -> (i32, i32, i32) {
    %c0_i32 = arith.constant 0 : i32
    %c0_i32_0 = arith.constant 0 : i32
    %c0_i32_1 = arith.constant 0 : i32
    return %arg0, %c0_i32, %c0_i32_0 : i32, i32, i32
  }
  func.func @transform_8(%arg0: i32) -> (i32, i32, i32) {
    %c0_i32 = arith.constant 0 : i32
    %c0_i32_0 = arith.constant 0 : i32
    %c0_i32_1 = arith.constant 0 : i32
    return %arg0, %c0_i32, %c0_i32_0 : i32, i32, i32
  }
  func.func @transform_9(%arg0: i32) -> (i32, i32, i32) {
    %c0_i32 = arith.constant 0 : i32
    %c0_i32_0 = arith.constant 0 : i32
    %c0_i32_1 = arith.constant 0 : i32
    return %arg0, %c0_i32, %c0_i32_0 : i32, i32, i32
  }
  func.func @transform_10(%arg0: i32) -> (i32, i32, i32) {
    %c0_i32 = arith.constant 0 : i32
    %c0_i32_0 = arith.constant 0 : i32
    %c0_i32_1 = arith.constant 0 : i32
    return %arg0, %c0_i32, %c0_i32_0 : i32, i32, i32
  }
  func.func @transform_11(%arg0: i32) -> (i32, i32, i32) {
    %c0_i32 = arith.constant 0 : i32
    %c0_i32_0 = arith.constant 0 : i32
    %c0_i32_1 = arith.constant 0 : i32
    return %arg0, %c0_i32, %c0_i32_0 : i32, i32, i32
  }
  func.func @transform_12(%arg0: i32) -> (i32, i32, i32) {
    %c0_i32 = arith.constant 0 : i32
    %c0_i32_0 = arith.constant 0 : i32
    %c0_i32_1 = arith.constant 0 : i32
    return %arg0, %c0_i32, %c0_i32_0 : i32, i32, i32
  }
  func.func @transform_13(%arg0: i32) -> (i32, i32, i32) {
    %c0_i32 = arith.constant 0 : i32
    %c0_i32_0 = arith.constant 0 : i32
    %c0_i32_1 = arith.constant 0 : i32
    return %arg0, %c0_i32, %c0_i32_0 : i32, i32, i32
  }
  func.func @transform_14(%arg0: i32) -> (i32, i32) {
    %c0_i32 = arith.constant 0 : i32
    %c0_i32_0 = arith.constant 0 : i32
    %c0_i32_1 = arith.constant 0 : i32
    return %c0_i32, %c0_i32_0 : i32, i32
  }
  func.func @transform_15(%arg0: i32) -> (i32, i32) {
    %c0_i32 = arith.constant 0 : i32
    %c0_i32_0 = arith.constant 0 : i32
    %c0_i32_1 = arith.constant 0 : i32
    return %c0_i32, %c0_i32_0 : i32, i32
  }
  func.func @transform_16(%arg0: i32) -> (i32, i32) {
    %c0_i32 = arith.constant 0 : i32
    %c0_i32_0 = arith.constant 0 : i32
    %c0_i32_1 = arith.constant 0 : i32
    return %c0_i32, %c0_i32_0 : i32, i32
  }
}

</mosaic_0001>

<bundles_post_ra>
// kernel: transformer_forward.1
= control target key start
LH: loop header
LB: loop body
LE: loop exit
PB: predicated region body
PF: predicated region fallthrough
CT: control target
= control target key end

     0   :  { %s4762_s0 = inlined_call_operand.vmem [shape: f32[16,16], index: 0, kind: input, shape index: {}]   ;;  %s4763_s1 = inlined_call_operand.vmem [shape: f32[16,16], index: 1, kind: input, shape index: {}]   ;;  %s4764_s2 = inlined_call_operand.vmem [shape: f32[2,3,16,16], index: 2, kind: input, shape index: {}]   ;;  %s4765_s3 = inlined_call_operand.vmem [shape: f32[2,3,1,16], index: 3, kind: input, shape index: {}]   ;;  %s4766_s4 = inlined_call_operand.vmem [shape: f32[2,16,16], index: 4, kind: input, shape index: {}]   ;;  %s4767_s5 = inlined_call_operand.vmem [shape: f32[2,1,16], index: 5, kind: input, shape index: {}]   ;;  %s4768_s6 = inlined_call_operand.vmem [shape: f32[2,1,16], index: 6, kind: input, shape index: {}]   ;;  %s4769_s7 = inlined_call_operand.vmem [shape: f32[2,1,16], index: 7, kind: input, shape index: {}]   ;;  %s4770_s8 = inlined_call_operand.vmem [shape: bf16[2,16,2048], index: 8, kind: input, shape index: {}]   ;;  %s4771_s9 = inlined_call_operand.vmem [shape: f32[2,1,2048], index: 9, kind: input, shape index: {}]   ;;  %s4772_s10 = inlined_call_operand.vmem [shape: bf16[2,2048,16], index: 10, kind: input, shape index: {}]   ;;  %s4773_s11 = inlined_call_operand.vmem [shape: f32[2,1,16], index: 11, kind: input, shape index: {}]   ;;  %s4774_s12 = inlined_call_operand.vmem [shape: f32[2,1,16], index: 12, kind: input, shape index: {}]   ;;  %s4775_s13 = inlined_call_operand.vmem [shape: f32[2,1,16], index: 13, kind: input, shape index: {}]   ;;  %s4776_s14 = inlined_call_operand.vmem [shape: f32[16,8], index: 14, kind: input, shape index: {}]   ;;  %s4777_s15 = inlined_call_operand.vmem [shape: f32[1,8], index: 15, kind: input, shape index: {}]   ;;  %s4778_s16 = inlined_call_operand.hbm [shape: f32[16,8], index: 16, kind: output, shape index: {}]  }
   0x1   :  { %4785 = sst [smem:[#allocation8_spill]] %s4762_s0 }
   0x2   :  { %4786 = sst [smem:[#allocation9_spill]] %s4763_s1 }
   0x3   :  { %4787 = sst [smem:[#allocation10_spill]] %s4764_s2 }
   0x4   :  { %4788 = sst [smem:[#allocation11_spill]] %s4766_s4 }
   0x5   :  { %4789 = sst [smem:[#allocation12_spill]] %s4776_s14 }
   0x6   :  { %4790 = sst [smem:[#allocation13_spill]] %s4777_s15 }
   0x7   :  { %4791 = sst [smem:[#allocation14_spill]] %s4778_s16 }
   0x8   :  { %21 = vsyncpa [#allocation4], 0  ;;  %s4313_s21 = smov 0  }
   0x9 LB: > { %4792 = sst [smem:[#allocation6_spill]] %s4222_s21  ;;  %s4319_s22 = sadd.s32 4294967295, %s4222_s21   ;;  %s4222_s21 = sphi %s4313_s21, %s27_s21  }
   0xa   : > { %p3537_p0 = scmp.ge.s32.totalorder %s4222_s21, 1  ;;  %p554_p1 = scmp.lt.s32.totalorder %s4222_s21, 3 }
   0xc   : > { %p555_p2 = pnand %p3537_p0, %p554_p1 }
   0xe   : > { %558 = sbr.rel (%p555_p2) target bundleno = 2652 (0xa5c), region = 84 }
  0x15   : > { %p640_p3 = scmp.lt.s32.totalorder %s4319_s22, 1  ;;  %s4793_s4 = sld [smem:[#allocation11_spill]] }
  0x16   : > { %s4795_s2 = sld [smem:[#allocation10_spill]]  ;;  %p3546_p4 = scmp.ne.s32.totalorder %s4319_s22, 0 }
  0x17   : > { %s4325_s23 = scalar_select %p640_p3, %s4319_s22, 1 }
  0x18   : > { %s4796_s20 = sld [smem:[#allocation8_spill]] (!%p3546_p4)  ;;  %vm693_vm0 = vcmask (!%p3546_p4), 130048  }
  0x19   : > { %s4022_s24 = smul.u32 48, %s4325_s23  ;;  %s3736_s25 = sshll.u32 %s4325_s23, 4 }
  0x1a   : > { %s4023_s26 = smul.u32 3, %s4325_s23  ;;  %s3737_s30 = sshll.u32 %s4325_s23, 7 }
  0x1b   : > { %s4333_s29 = scalar_lea.vmem %s4793_s4, %s3736_s25  ;;  %s4366_s16 = scalar_lea.vmem %s4771_s9, %s3736_s25 }
  0x1c   : > { %4794 = sst [smem:[#allocation7_spill]] %s4333_s29  ;;  %s4338_s17 = scalar_lea.vmem %s4795_s2, %s4022_s24 }
  0x1d   : > { %s4347_s15 = scalar_lea.vmem %s4765_s3, %s4023_s26  ;;  %s4361_s2 = scalar_lea.vmem %s4770_s8, %s3737_s30 }
  0x1e   : > { %s3738_s21 = sshll.u32 %s4325_s23, 10  ;;  %s679_s1 = scalar_lea.vmem %s4773_s11, %s4325_s23  ;;  %v691_v0 = vld [vmem:[%s4796_s20] sm:$0xff] (!%p3546_p4)  ;;  %v692_v1 = vld [vmem:[%s4796_s20 + $0x8] sm:$0xff] (!%p3546_p4) }
  0x1f   : > { %s4376_s4 = scalar_lea.vmem %s4772_s10, %s3738_s21  ;;  %s682_s30 = scalar_lea.vmem %s4774_s12, %s4325_s23  ;;  %694 = vst.msk [vmem:[#allocation2] sm:$0xff] (!%p3546_p4), %vm693_vm0, %v691_v0  ;;  %695 = vst.msk [vmem:[#allocation2 + $0x8] sm:$0xff] (!%p3546_p4), %vm693_vm0, %v692_v1 }
  0x20   : > { %s685_s18 = scalar_lea.vmem %s4775_s13, %s4325_s23  ;;  %690 = sbr.rel (%p3546_p4) target bundleno = 39 (0x27), region = 88 }
  0x27 PF: > { %v3550_v2 = vld [vmem:[%s4338_s17 + $0x10] sm:$0xff]  ;;  %v3551_v3 = vld [vmem:[%s4338_s17 + $0x18] sm:$0xff]  ;;  %v4395_v4 = vld [vmem:[#allocation2] sm:$0xff]  ;;  %vm707_vm1 = vcmask 130048   ;;  %s4797_s14 = sld [smem:[#allocation9_spill]]  ;;  %s4799_s25 = scalar_lea.vmem %s4767_s5, %s4325_s23 }
  0x28   : > { %v3996_v5 = vpack.c.bf16 %v3551_v3, %v3550_v2  ;;  %3954 = vmatprep.mubr.msk.f32.mxu1 %vm707_vm1, %v4395_v4  ;;  %v698_v6 = vld [vmem:[%s4338_s17] sm:$0xff]  ;;  %v699_v7 = vld [vmem:[%s4338_s17 + $0x8] sm:$0xff]  ;;  %3947 = vmatprep.mubr.msk.f32.mxu0 %vm707_vm1, %v4395_v4  ;;  %vm4005_vm2 = vmpackc.low %vm707_vm1, %vm707_vm1  ;;  %s4800_s27 = scalar_lea.vmem %s4768_s6, %s4325_s23  ;;  %s4801_s28 = scalar_lea.vmem %s4769_s7, %s4325_s23 }
  0x29   : > { %v4403_v8 = vld [vmem:[#allocation2 + $0x8] sm:$0xff]  ;;  %v3992_v9 = vpack.c.bf16 %v699_v7, %v698_v6  ;;  %v3553_v10 = vld [vmem:[%s4347_s15 + $0x1] ss:$0 sm:$0xff]  ;;  %v3547_v12 = vld [vmem:[%s4347_s15] ss:$0 sm:$0xff]  ;;  %p3728_p5 = scmp.ne.s32.totalorder %s4319_s22, 1 }
  0x2a   : > { %3997 = vmatprep.subr.bf16.mxu1 %v3996_v5  ;;  %v3556_v23 = vld [vmem:[%s4338_s17 + $0x20] sm:$0xff]  ;;  %v3557_v24 = vld [vmem:[%s4338_s17 + $0x28] sm:$0xff]  ;;  %s4798_s17 = sld [smem:[#allocation7_spill]]  ;;  %s4802_s0 = sld [smem:[#allocation12_spill]] (!%p3728_p5)  ;;  %vm3369_vm3 = vcmask (!%p3728_p5), 64512  }
  0x2b   : > { %3999 = vmatpush3.bf16.msra.mxu1 %v3996_v5  ;;  %3993 = vmatprep.subr.bf16.mxu0 %v3992_v9  ;;  %v4000_v25 = vpack.c.bf16 %v3557_v24, %v3556_v23  ;;  %v3559_v45 = vld [vmem:[%s4347_s15 + $0x2] ss:$0 sm:$0xff]  ;;  %v3568_v61 = vld [vmem:[%s4799_s25] ss:$0 sm:$0xff]  ;;  %v4224_v24 = vmov 0   ;;  %s4803_s26 = sld [smem:[#allocation13_spill]] (!%p3728_p5) }
  0x2c   : > { %3995 = vmatpush3.bf16.msra.mxu0 %v3992_v9 }
  0x2d   : > { %4001 = vmatprep.subr.bf16.mxu0 %v4000_v25  ;;  %v963_v26 = vld [vmem:[%s4797_s14] sm:$0xff]  ;;  %v964_v28 = vld [vmem:[%s4797_s14 + $0x8] sm:$0xff] }
  0x2e   : > { %3955 = vmatmul.mubr.msk.f32.vlgmr.msra.gmra.mrb[0].mxu1 %vm707_vm1, %v4403_v8 }
  0x2f   : > { %3948 = vmatmul.mubr.msk.f32.vlgmr.msra.gmra.mrb[0].mxu0 %vm707_vm1, %v4403_v8 }
  0x30   : > { %3961 = vmatprep.mubr.msk.f32.mxu0 %vm707_vm1, %v4395_v4  ;;  %4003 = vmatpush3.bf16.msra.mxu0 %v4000_v25  ;;  %v1155_v50 = vld [vmem:[%s4798_s17] sm:$0xff]  ;;  %v1156_v51 = vld [vmem:[%s4798_s17 + $0x8] sm:$0xff]  ;;  %v1295_v25 = vld [vmem:[%s4361_s2 + $0x10] sm:$0xff] }
  0x31   : > { %v4014_v52 = vpack.c.bf16 %v1156_v51, %v1155_v50  ;;  %v1305_v50 = vld [vmem:[%s4361_s2 + $0x60] sm:$0xff]  ;;  %v1298_v51 = vld [vmem:[%s4361_s2 + $0x28] sm:$0xff] }
  0x33   : > { %3962 = vmatmul.mubr.msk.f32.vlgmr.msra.gmra.mrb[2].mxu0 %vm707_vm1, %v4403_v8 }
 0x101   : > { %v3956_v11 = vpop.f32.mrb[0].mxu1 }
 0x102   : > { %v874_v13 = vadd.f32 %v3956_v11, %v3553_v10  ;;  %v868_v14 = vpop.f32.mrb[1].mxu1  ;;  %v3949_v15 = vpop.f32.mrb[0].mxu0 }
 0x103   : > { %v869_v16 = vadd.f32 %v3553_v10, %v868_v14  ;;  %v780_v17 = vpop.f32.mrb[1].mxu0  ;;  %v786_v21 = vadd.f32 %v3949_v15, %v3547_v12 }
 0x104   : > { %v781_v18 = vadd.f32 %v3547_v12, %v780_v17  ;;  %v1301_v17 = vld [vmem:[%s4361_s2 + $0x40] sm:$0xff] }
 0x105   : > { %v4004_v19 = vpack.c.bf16 %v874_v13, %v869_v16  ;;  %v790_v22 = vmul.f32 0.25, %v786_v21  ;;  %v1293_v16 = vld [vmem:[%s4361_s2] sm:$0xff] }
 0x106   : > { %v789_v20 = vmul.f32 0.25, %v781_v18  ;;  %v3963_v44 = vpop.f32.mrb[2].mxu0  ;;  %v1294_v18 = vld [vmem:[%s4361_s2 + $0x8] sm:$0xff]  ;;  %v3573_v21 = vcombine.low %v1293_v16, %v1301_v17 }
 0x107   : > { %4006 = vmatprep.subr.msk.bf16.mxu1 %vm4005_vm2, %v4004_v19  ;;  %v954_v46 = vpop.f32.mrb[3].mxu0  ;;  %v960_v47 = vadd.f32 %v3963_v44, %v3559_v45 }
 0x108   : > { %4009 = vmatpush3.bf16.xpose.msk.msra.mxu1 %vm4005_vm2, %v4004_v19  ;;  %3968 = vmatprep.mubr.msk.f32.mxu1 %vm707_vm1, %v789_v20  ;;  %v955_v48 = vadd.f32 %v3559_v45, %v954_v46  ;;  %v3574_v19 = vcombine.high %v1293_v16, %v1301_v17  ;;  %v1302_v20 = vld [vmem:[%s4361_s2 + $0x48] sm:$0xff]  ;;  %v4056_v16 = vld [vmem:[%s4376_s4 + $0x18] sm:$0xff]  }
 0x109   : > { %v3576_v23 = vcombine.high %v1294_v18, %v1302_v20  ;;  %v4057_v17 = vld [vmem:[%s4376_s4 + $0x98] sm:$0xff]  }
 0x10a   : > { %v4010_v49 = vpack.c.bf16 %v960_v47, %v955_v48  ;;  %1476 = vmatprep.subr.bf16.mxu1 %v3574_v19  ;;  %v1297_v48 = vld [vmem:[%s4361_s2 + $0x20] sm:$0xff] }
 0x10b   : > { %v4059_v19 = vld [vmem:[%s4376_s4 + $0xe0] sm:$0xff]  }
 0x10c   : > { %4011 = vmatprep.subr.bf16.mxu0 %v4010_v49 }
 0x10d   : > { %4013 = vmatpush3.bf16.msra.mxu0 %v4010_v49 }
 0x10e   : > { %4015 = vmatprep.subr.bf16.mxu0 %v4014_v52 }
 0x10f   : > { %3969 = vmatmul.mubr.msk.f32.vlgmr.msra.gmra.mrb[2].mxu1 %vm707_vm1, %v790_v22  ;;  %v3575_v22 = vcombine.low %v1294_v18, %v1302_v20  ;;  %v4058_v18 = vld [vmem:[%s4376_s4 + $0x60] sm:$0xff]  }
 0x110   : > { %1477 = vmatpush1.bf16.msra.mxu1 %v3573_v21  ;;  %1508 = vmatprep.mubr.bf16.mxu1 %v4224_v24  ;;  %v4060_v20 = vld [vmem:[%s4376_s4 + $0x20] sm:$0xff]  }
 0x111   : > { %v4061_v21 = vld [vmem:[%s4376_s4 + $0xa0] sm:$0xff]  }
 0x1e2   : > { %v3970_v27 = vpop.f32.mrb[2].mxu1 }
 0x1e3   : > { %v1043_v29 = vpop.f32.mrb[3].mxu1  ;;  %v1049_v31 = vadd.f32 %v3970_v27, %v964_v28  ;;  %v1296_v27 = vld [vmem:[%s4361_s2 + $0x18] sm:$0xff] }
 0x1e4   : > { %v1044_v30 = vadd.f32 %v1043_v29, %v963_v26  ;;  %v1303_v26 = vld [vmem:[%s4361_s2 + $0x50] sm:$0xff] }
 0x1e5   : > { %v1055_v33 = vsel %vm707_vm1, %v1049_v31, -inf  ;;  %v3577_v28 = vcombine.low %v1295_v25, %v1303_v26  ;;  %v3578_v29 = vcombine.high %v1295_v25, %v1303_v26  ;;  %v4065_v25 = vld [vmem:[%s4376_s4 + $0xa8] sm:$0xff]   ;;  %v4066_v26 = vld [vmem:[%s4376_s4 + $0x70] sm:$0xff]  }
 0x1e6   : > { %v1052_v32 = vsel %vm707_vm1, %v1044_v30, -inf }
 0x1e7   : > { %1053 = vmax.xlane.f32.xlu0 %v1052_v32  ;;  %1562 = vmatprep.subr.bf16.mxu1 %v3578_v29  ;;  %v4069_v29 = vld [vmem:[%s4376_s4 + $0xb0] sm:$0xff]  }
 0x1eb   : > { %1056 = vmax.xlane.f32.xlu0 %v1055_v33 }
 0x274   : > { %v1054_v34 = vpop.xlane.xlu0 %1053 }
 0x275   : > { %v1058_v35 = vsub.f32 %v1044_v30, %v1054_v34  ;;  %v1304_v30 = vld [vmem:[%s4361_s2 + $0x58] sm:$0xff] }
 0x276   : > { %v3580_v32 = vcombine.high %v1296_v27, %v1304_v30 }
 0x277   : > { %v1060_v36 = vmul.f32 1.442695, %v1058_v35 }
 0x278   : > { %v1057_v37 = vpop.xlane.xlu0 %1056 }
 0x279   : > { %4170 = vpow2.f32 %v1060_v36  ;;  %v1059_v38 = vsub.f32 %v1049_v31, %v1057_v37  ;;  %v3579_v31 = vcombine.low %v1296_v27, %v1304_v30  ;;  %v4067_v27 = vld [vmem:[%s4376_s4 + $0xf0] sm:$0xff]   ;;  %v4070_v30 = vld [vmem:[%s4376_s4 + $0x78] sm:$0xff]  }
 0x27b   : > { %v1062_v39 = vmul.f32 1.442695, %v1059_v38 }
 0x27d   : > { %4172 = vpow2.f32 %v1062_v39 }
 0x283   : > { %v4171_v40 = vpop.eup %4170 }
 0x284   : > { %v1064_v41 = vsel %vm707_vm1, %v4171_v40, 0.0 }
 0x285   : > { %1065 = vadd.xlane.f32.xlu1 %v1064_v41 }
 0x287   : > { %v4173_v42 = vpop.eup %4172 }
 0x288   : > { %v1067_v43 = vsel %vm707_vm1, %v4173_v42, 0.0 }
 0x289   : > { %1068 = vadd.xlane.f32.xlu1 %v1067_v43  ;;  %v3572_v43 = vld [vmem:[%s4801_s28] ss:$0 sm:$0xff] }
 0x312   : > { %v1066_v53 = vpop.xlane.xlu1 %1065 }
 0x313   : > { %4174 = vrcp.f32 %v1066_v53 }
 0x316   : > { %v1069_v54 = vpop.xlane.xlu1 %1068 }
 0x317   : > { %4176 = vrcp.f32 %v1069_v54  ;;  %v3582_v54 = vcombine.high %v1297_v48, %v1305_v50 }
 0x31d   : > { %v4175_v55 = vpop.eup %4174 }
 0x31e   : > { %v1072_v56 = vmul.f32 %v4175_v55, %v4171_v40  ;;  %v3571_v40 = vld [vmem:[%s4800_s27] ss:$0 sm:$0xff] }
 0x320   : > { %3975 = vmatprep.mubr.msk.f32.mxu0 %vm707_vm1, %v1072_v56  ;;  %v1299_v56 = vld [vmem:[%s4361_s2 + $0x30] sm:$0xff] }
 0x321   : > { %v4177_v57 = vpop.eup %4176 }
 0x322   : > { %v1073_v58 = vmul.f32 %v4177_v57, %v4173_v42  ;;  %v1307_v57 = vld [vmem:[%s4361_s2 + $0x70] sm:$0xff] }
 0x324   : > { %3976 = vmatmul.mubr.msk.f32.vlgmr.msra.gmra.mrb[4].mxu0 %vm707_vm1, %v1073_v58  ;;  %v1300_v58 = vld [vmem:[%s4361_s2 + $0x38] sm:$0xff] }
 0x325   : > { %4017 = vmatpush3.bf16.msra.mxu0 %v4014_v52  ;;  %v1306_v52 = vld [vmem:[%s4361_s2 + $0x68] sm:$0xff] }
 0x326   : > { %1519 = vmatprep.subr.bf16.mxu0 %v3576_v23  ;;  %v3584_v55 = vcombine.high %v1298_v51, %v1306_v52  ;;  %v4063_v23 = vld [vmem:[%s4376_s4 + $0xe8] sm:$0xff]  }
 0x3f7   : > { %v3977_v59 = vpop.f32.mrb[4].mxu0 }
 0x3f8   : > { %v1146_v60 = vpop.f32.mrb[5].mxu0 }
 0x3f9   : > { %3982 = vmatprep.mubr.msk.f32.mxu0 %vm707_vm1, %v1146_v60  ;;  %v3581_v60 = vcombine.low %v1297_v48, %v1305_v50 }
 0x3fa   : > { %3983 = vmatmul.mubr.msk.f32.vlgmr.msra.gmra.mrb[6].mxu0 %vm707_vm1, %v3977_v59  ;;  %v1308_v59 = vld [vmem:[%s4361_s2 + $0x78] sm:$0xff] }
 0x3fb   : > { %1520 = vmatpush1.bf16.msra.mxu0 %v3575_v22  ;;  %1551 = vmatprep.mubr.bf16.mxu0 %v4224_v24  ;;  %v4062_v22 = vld [vmem:[%s4376_s4 + $0x68] sm:$0xff]  }
 0x3fc   : > { %1605 = vmatprep.subr.bf16.mxu0 %v3580_v32  ;;  %v4072_v32 = vld [vmem:[%s4376_s4 + $0x38] sm:$0xff]  }
 0x4cd   : > { %v3984_v62 = vpop.f32.mrb[6].mxu0 }
 0x4ce   : > { %v1242_v63 = vadd.f32 %v3984_v62, %v3568_v61  ;;  %v1236_v0 = vpop.f32.mrb[7].mxu0  ;;  %v3586_v62 = vcombine.high %v1299_v56, %v1307_v57 }
 0x4cf   : > { %v1237_v1 = vadd.f32 %v3568_v61, %v1236_v0  ;;  %v3583_v61 = vcombine.low %v1298_v51, %v1306_v52  ;;  %v3585_v0 = vcombine.low %v1299_v56, %v1307_v57 }
 0x4d0   : > { %v1246_v2 = vadd.f32 %v1242_v63, %v4403_v8  ;;  %v3588_v63 = vcombine.high %v1300_v58, %v1308_v59 }
 0x4d1   : > { %v1245_v3 = vadd.f32 %v1237_v1, %v4395_v4  ;;  %v3587_v1 = vcombine.low %v1300_v58, %v1308_v59 }
 0x4d2   : > { %v1252_v5 = vsel %vm707_vm1, %v1246_v2, 0.0 }
 0x4d3   : > { %1253 = vadd.xlane.f32.xlu1 %v1252_v5  ;;  %v1249_v6 = vsel %vm707_vm1, %v1245_v3, 0.0  ;;  %v4044_v5 = vld [vmem:[%s4376_s4] sm:$0xff]  }
 0x4d4   : > { %1250 = vadd.xlane.f32.xlu0 %v1249_v6  ;;  %v4045_v6 = vld [vmem:[%s4376_s4 + $0x80] sm:$0xff]  }
 0x560   : > { %v1254_v7 = vpop.xlane.xlu1 %1253 }
 0x561   : > { %v1257_v9 = vmul.f32 0.0625, %v1254_v7  ;;  %v1251_v10 = vpop.xlane.xlu0 %1250  ;;  %v4046_v7 = vld [vmem:[%s4376_s4 + $0x48] sm:$0xff]  }
 0x562   : > { %v1256_v11 = vmul.f32 0.0625, %v1251_v10  ;;  %v4048_v10 = vld [vmem:[%s4376_s4 + $0x8] sm:$0xff]  }
 0x563   : > { %v1259_v12 = vsub.f32 %v1246_v2, %v1257_v9  ;;  %v4042_v2 = vld [vmem:[%s4376_s4 + $0x40] sm:$0xff]   ;;  %v4047_v9 = vld [vmem:[%s4376_s4 + $0xc8] sm:$0xff]  }
 0x564   : > { %v1258_v13 = vsub.f32 %v1245_v3, %v1256_v11  ;;  %v4043_v3 = vld [vmem:[%s4376_s4 + $0xc0] sm:$0xff]   ;;  %v4049_v11 = vld [vmem:[%s4376_s4 + $0x88] sm:$0xff]  }
 0x565   : > { %v1261_v14 = vmul.f32 %v1259_v12, %v1259_v12 }
 0x566   : > { %v1260_v8 = vmul.f32 %v1258_v13, %v1258_v13 }
 0x567   : > { %v1265_v4 = vsel %vm707_vm1, %v1261_v14, 0.0  ;;  %v4052_v14 = vld [vmem:[%s4376_s4 + $0x10] sm:$0xff]  }
 0x568   : > { %1266 = vadd.xlane.f32.xlu1 %v1265_v4  ;;  %v1262_v15 = vsel %vm707_vm1, %v1260_v8, 0.0  ;;  %v4053_v8 = vld [vmem:[%s4376_s4 + $0x90] sm:$0xff]   ;;  %v4054_v4 = vld [vmem:[%s4376_s4 + $0x58] sm:$0xff]  }
 0x569   : > { %1263 = vadd.xlane.f32.xlu0 %v1262_v15  ;;  %v4055_v15 = vld [vmem:[%s4376_s4 + $0xd8] sm:$0xff]  }
 0x5f5   : > { %v1267_v33 = vpop.xlane.xlu1 %1266 }
 0x5f6   : > { %v1269_v34 = vmul.f32 0.0625, %v1267_v33  ;;  %v1264_v35 = vpop.xlane.xlu0 %1263  ;;  %v4073_v33 = vld [vmem:[%s4376_s4 + $0xb8] sm:$0xff]  }
 0x5f7   : > { %v1268_v36 = vmul.f32 0.0625, %v1264_v35  ;;  %v4075_v35 = vld [vmem:[%s4376_s4 + $0x1c0] sm:$0xff]  }
 0x5f8   : > { %v1271_v37 = vadd.f32 1e-05, %v1269_v34  ;;  %v4074_v34 = vld [vmem:[%s4376_s4 + $0x140] sm:$0xff]  }
 0x5f9   : > { %v1270_v38 = vadd.f32 1e-05, %v1268_v36  ;;  %v1313_v36 = vlaneseq }
 0x5fa   : > { %4178 = vrsqrt.f32 %v1271_v37 }
 0x5fb   : > { %4180 = vrsqrt.f32 %v1270_v38  ;;  %v4531_v37 = vshrl.u32 %v1313_v36, 7 }
 0x5fd   : > { %v1339_v38 = vsub.s32 6, %v4531_v37  ;;  %v1331_v52 = vsub.s32 4, %v4531_v37  ;;  %v1343_v56 = vsub.s32 7, %v4531_v37 }
 0x604   : > { %v4179_v39 = vpop.eup %4178 }
 0x605   : > { %v4181_v41 = vpop.eup %4180  ;;  %v1275_v42 = vmul.f32 %v4179_v39, %v1259_v12  ;;  %v4050_v12 = vld [vmem:[%s4376_s4 + $0x50] sm:$0xff]   ;;  %v4535_v39 = vld [vmem:[%s4366_s16 + $0x8] sm:$0xff] }
 0x606   : > { %v1274_v44 = vmul.f32 %v4181_v41, %v1258_v13  ;;  %v4051_v13 = vld [vmem:[%s4376_s4 + $0xd0] sm:$0xff]   ;;  %v1315_v41 = vsub.s32 0, %v4531_v37 }
 0x607   : > { %v1283_v45 = vmul.f32 %v3571_v40, %v1275_v42  ;;  %v1323_v42 = vsub.s32 2, %v4531_v37 }
 0x608   : > { %v1282_v46 = vmul.f32 %v3571_v40, %v1274_v44  ;;  %v4538_v40 = vrot.slane %v4535_v39, %v1339_v38  ;;  %v1319_v44 = vsub.s32 1, %v4531_v37 }
 0x609   : > { %v4469_v47 = vadd.f32 %v3572_v43, %v1283_v45  ;;  %v1327_v45 = vsub.s32 3, %v4531_v37 }
 0x60a   : > { %v4472_v49 = vadd.f32 %v3572_v43, %v1282_v46  ;;  %v1309_v43 = vld [vmem:[%s4366_s16] sm:$0xff] }
 0x60b   : > { %v1316_v46 = vrot.slane %v1309_v43, %v1315_v41  ;;  %v1324_v48 = vrot.slane %v1309_v43, %v1323_v42  ;;  %v1320_v50 = vrot.slane %v1309_v43, %v1319_v44  ;;  %v1328_v51 = vrot.slane %v1309_v43, %v1327_v45 }
 0x60c   : > { %v1292_v53 = vpack.c.bf16 %v4469_v47, %v4472_v49 }
 0x60e   : > { %3589 = vmatmul.mubr.msk.bf16.vlgmr.msra.gmra.mrb[4].mxu1 %vm707_vm1, %v1292_v53  ;;  %3590 = vmatmul.mubr.msk.bf16.vlgmr.msra.gmra.mrb[8].mxu0 %vm707_vm1, %v1292_v53 }
 0x60f   : > { %1563 = vmatpush1.bf16.msra.mxu1 %v3577_v28  ;;  %1606 = vmatpush1.bf16.msra.mxu0 %v3579_v31  ;;  %v4068_v28 = vld [vmem:[%s4376_s4 + $0x30] sm:$0xff]   ;;  %v4071_v31 = vld [vmem:[%s4376_s4 + $0xf8] sm:$0xff]  }
 0x610   : > { %1594 = vmatprep.mubr.bf16.mxu1 %v4224_v24  ;;  %1637 = vmatprep.mubr.bf16.mxu0 %v4224_v24 }
 0x611   : > { %1648 = vmatprep.subr.bf16.mxu1 %v3582_v54  ;;  %1691 = vmatprep.subr.bf16.mxu0 %v3584_v55  ;;  %v1335_v55 = vsub.s32 5, %v4531_v37 }
 0x616   : > { %3591 = vmatmul.mubr.msk.bf16.vlgmr.msra.gmra.mrb[8].mxu1 %vm707_vm1, %v1292_v53  ;;  %3592 = vmatmul.mubr.msk.bf16.vlgmr.msra.gmra.mrb[12].mxu0 %vm707_vm1, %v1292_v53 }
 0x617   : > { %1649 = vmatpush1.bf16.msra.mxu1 %v3581_v60  ;;  %1692 = vmatpush1.bf16.msra.mxu0 %v3583_v61 }
 0x618   : > { %1680 = vmatprep.mubr.bf16.mxu1 %v4224_v24  ;;  %1723 = vmatprep.mubr.bf16.mxu0 %v4224_v24 }
 0x619   : > { %1734 = vmatprep.subr.bf16.mxu1 %v3586_v62  ;;  %1777 = vmatprep.subr.bf16.mxu0 %v3588_v63 }
 0x61e   : > { %3593 = vmatmul.mubr.msk.bf16.vlgmr.msra.gmra.mrb[12].mxu1 %vm707_vm1, %v1292_v53  ;;  %3594 = vmatmul.mubr.msk.bf16.vlgmr.msra.gmra.mrb[16].mxu0 %vm707_vm1, %v1292_v53 }
 0x61f   : > { %1735 = vmatpush1.bf16.msra.mxu1 %v3585_v0  ;;  %1778 = vmatpush1.bf16.msra.mxu0 %v3587_v1 }
 0x620   : > { %1766 = vmatprep.mubr.bf16.mxu1 %v4224_v24  ;;  %1809 = vmatprep.mubr.bf16.mxu0 %v4224_v24  ;;  %v4064_v24 = vld [vmem:[%s4376_s4 + $0x28] sm:$0xff]  }
 0x621   : > { %3763 = vmatprep.subr.bf16.mxu1 %v4042_v2  ;;  %3785 = vmatprep.subr.bf16.mxu0 %v4043_v3 }
 0x626   : > { %3595 = vmatmul.mubr.msk.bf16.vlgmr.msra.gmra.mrb[16].mxu1 %vm707_vm1, %v1292_v53  ;;  %3596 = vmatmul.mubr.msk.bf16.vlgmr.msra.gmra.mrb[20].mxu0 %vm707_vm1, %v1292_v53 }
 0x627   : > { %3764 = vmatpush3.bf16.msra.mxu1 %v4044_v5  ;;  %3786 = vmatpush3.bf16.msra.mxu0 %v4045_v6  ;;  %v1332_v6 = vrot.slane %v1309_v43, %v1331_v52 }
 0x628   : > { %3765 = vmatprep.subr.bf16.mxu1 %v4046_v7  ;;  %3787 = vmatprep.subr.bf16.mxu0 %v4047_v9  ;;  %v1340_v7 = vrot.slane %v1309_v43, %v1339_v38 }
 0x62b   : > { %3766 = vmatpush3.bf16.msra.mxu1 %v4048_v10  ;;  %3788 = vmatpush3.bf16.msra.mxu0 %v4049_v11  ;;  %v1336_v11 = vrot.slane %v1309_v43, %v1335_v55 }
 0x62c   : > { %3767 = vmatprep.subr.bf16.mxu1 %v4050_v12  ;;  %3789 = vmatprep.subr.bf16.mxu0 %v4051_v13  ;;  %v1344_v12 = vrot.slane %v1309_v43, %v1343_v56  ;;  %v1356_v43 = vrot.slane %v4535_v39, %v1323_v42  ;;  %v1360_v42 = vrot.slane %v4535_v39, %v1327_v45 }
 0x62f   : > { %3768 = vmatpush3.bf16.msra.mxu1 %v4052_v14  ;;  %3790 = vmatpush3.bf16.msra.mxu0 %v4053_v8 }
 0x630   : > { %3769 = vmatprep.subr.bf16.mxu1 %v4054_v4  ;;  %3791 = vmatprep.subr.bf16.mxu0 %v4055_v15 }
 0x633   : > { %3770 = vmatpush3.bf16.msra.mxu1 %v4056_v16  ;;  %3792 = vmatpush3.bf16.msra.mxu0 %v4057_v17 }
 0x634   : > { %3771 = vmatprep.subr.bf16.mxu1 %v4058_v18  ;;  %3793 = vmatprep.subr.bf16.mxu0 %v4059_v19 }
 0x637   : > { %3772 = vmatpush3.bf16.msra.mxu1 %v4060_v20  ;;  %3794 = vmatpush3.bf16.msra.mxu0 %v4061_v21 }
 0x638   : > { %3773 = vmatprep.subr.bf16.mxu1 %v4062_v22  ;;  %3795 = vmatprep.subr.bf16.mxu0 %v4063_v23 }
 0x63b   : > { %3774 = vmatpush3.bf16.msra.mxu1 %v4064_v24  ;;  %3796 = vmatpush3.bf16.msra.mxu0 %v4065_v25  ;;  %v4076_v25 = vld [vmem:[%s4376_s4 + $0x100] sm:$0xff]  }
 0x63c   : > { %3775 = vmatprep.subr.bf16.mxu1 %v4066_v26  ;;  %3797 = vmatprep.subr.bf16.mxu0 %v4067_v27  ;;  %v4077_v26 = vld [vmem:[%s4376_s4 + $0x180] sm:$0xff]  }
 0x63f   : > { %3776 = vmatpush3.bf16.msra.mxu1 %v4068_v28  ;;  %3798 = vmatpush3.bf16.msra.mxu0 %v4069_v29 }
 0x640   : > { %3777 = vmatprep.subr.bf16.mxu1 %v4070_v30  ;;  %3799 = vmatprep.subr.bf16.mxu0 %v4071_v31  ;;  %v4078_v31 = vld [vmem:[%s4376_s4 + $0x148] sm:$0xff]  }
 0x643   : > { %3778 = vmatpush3.bf16.msra.mxu1 %v4072_v32  ;;  %3800 = vmatpush3.bf16.msra.mxu0 %v4073_v33  ;;  %v4079_v32 = vld [vmem:[%s4376_s4 + $0x1c8] sm:$0xff]   ;;  %v1348_v33 = vrot.slane %v4535_v39, %v1315_v41  ;;  %v1352_v41 = vrot.slane %v4535_v39, %v1319_v44  ;;  %v4083_v44 = vld [vmem:[%s4376_s4 + $0x1d0] sm:$0xff]  }
 0x644   : > { %3807 = vmatprep.subr.bf16.mxu1 %v4074_v34  ;;  %3829 = vmatprep.subr.bf16.mxu0 %v4075_v35 }
 0x6e1   : > { %v1510_v53 = vpop.f32.mrb[4].mxu1  ;;  %v1553_v54 = vpop.f32.mrb[8].mxu0 }
 0x6e2   : > { %v1511_v57 = vadd.f32 %v1510_v53, %v1316_v46  ;;  %v1554_v58 = vadd.f32 %v1553_v54, %v1324_v48  ;;  %v1512_v59 = vpop.f32.mrb[5].mxu1  ;;  %v1555_v60 = vpop.f32.mrb[9].mxu0 }
 0x6e3   : > { %v1513_v61 = vadd.f32 %v1512_v59, %v1320_v50  ;;  %v1556_v62 = vadd.f32 %v1555_v60, %v1328_v51  ;;  %v1514_v63 = vpop.f32.mrb[6].mxu1  ;;  %v1557_v0 = vpop.f32.mrb[10].mxu0 }
 0x6e4   : > { %v1515_v1 = vadd.f32 %v1514_v63, %v1316_v46  ;;  %v1558_v2 = vadd.f32 %v1557_v0, %v1324_v48  ;;  %v1516_v3 = vpop.f32.mrb[7].mxu1  ;;  %v1559_v5 = vpop.f32.mrb[11].mxu0  ;;  %v1820_v13 = vmax.f32 %v1511_v57, 0.0  ;;  %v1822_v14 = vmax.f32 %v1554_v58, 0.0  ;;  %v4080_v57 = vld [vmem:[%s4376_s4 + $0x108] sm:$0xff]   ;;  %v4082_v63 = vld [vmem:[%s4376_s4 + $0x150] sm:$0xff]  }
 0x6e5   : > { %v1517_v9 = vadd.f32 %v1516_v3, %v1320_v50  ;;  %v1560_v10 = vadd.f32 %v1559_v5, %v1328_v51  ;;  %v1821_v15 = vmax.f32 %v1513_v61, 0.0  ;;  %v1823_v16 = vmax.f32 %v1556_v62, 0.0  ;;  %v4081_v58 = vld [vmem:[%s4376_s4 + $0x188] sm:$0xff]  }
 0x6e6   : > { %v1836_v8 = vmax.f32 %v1515_v1, 0.0  ;;  %v1838_v4 = vmax.f32 %v1558_v2, 0.0 }
 0x6e7   : > { %v1837_v17 = vmax.f32 %v1517_v9, 0.0  ;;  %v1839_v18 = vmax.f32 %v1560_v10, 0.0 }
 0x6e8   : > { %v1852_v19 = vpack.c.bf16 %v1836_v8, %v1820_v13  ;;  %v1854_v20 = vpack.c.bf16 %v1838_v4, %v1822_v14 }
 0x6e9   : > { %v1853_v21 = vpack.c.bf16 %v1837_v17, %v1821_v15  ;;  %v1855_v22 = vpack.c.bf16 %v1839_v18, %v1823_v16  ;;  %v1596_v23 = vpop.f32.mrb[8].mxu1  ;;  %v1639_v24 = vpop.f32.mrb[12].mxu0  ;;  %v4086_v15 = vld [vmem:[%s4376_s4 + $0x158] sm:$0xff]  }
 0x6ea   : > { %v1597_v27 = vadd.f32 %v1596_v23, %v1332_v6  ;;  %v1640_v28 = vadd.f32 %v1639_v24, %v1340_v7  ;;  %v1598_v29 = vpop.f32.mrb[9].mxu1  ;;  %v1641_v30 = vpop.f32.mrb[13].mxu0  ;;  %v4087_v16 = vld [vmem:[%s4376_s4 + $0x1d8] sm:$0xff]  }
 0x6eb   : > { %v1599_v34 = vadd.f32 %v1598_v29, %v1336_v11  ;;  %v1642_v35 = vadd.f32 %v1641_v30, %v1344_v12  ;;  %v1600_v36 = vpop.f32.mrb[10].mxu1  ;;  %v1643_v38 = vpop.f32.mrb[14].mxu0  ;;  %2931 = vmatprep.mubr.bf16.mxu1 %v1853_v21  ;;  %2972 = vmatprep.mubr.bf16.mxu0 %v1855_v22  ;;  %v4088_v29 = vld [vmem:[%s4376_s4 + $0x118] sm:$0xff]  }
 0x6ec   : > { %v1601_v46 = vadd.f32 %v1600_v36, %v1332_v6  ;;  %v1644_v48 = vadd.f32 %v1643_v38, %v1340_v7  ;;  %v1602_v50 = vpop.f32.mrb[11].mxu1  ;;  %v1645_v51 = vpop.f32.mrb[15].mxu0  ;;  %2932 = vmatmul.mubr.bf16.vlgmr.msra.gmra.mrb[20].mxu1 %v1852_v19  ;;  %2973 = vmatmul.mubr.bf16.vlgmr.msra.gmra.mrb[24].mxu0 %v1854_v20  ;;  %v1824_v59 = vmax.f32 %v1597_v27, 0.0  ;;  %v1826_v60 = vmax.f32 %v1640_v28, 0.0  ;;  %v4089_v30 = vld [vmem:[%s4376_s4 + $0x198] sm:$0xff]  }
 0x6ed   : > { %v1603_v53 = vadd.f32 %v1602_v50, %v1336_v11  ;;  %v1646_v54 = vadd.f32 %v1645_v51, %v1344_v12  ;;  %3808 = vmatpush3.bf16.msra.mxu1 %v4076_v25  ;;  %3830 = vmatpush3.bf16.msra.mxu0 %v4077_v26  ;;  %v1825_v0 = vmax.f32 %v1599_v34, 0.0  ;;  %v1827_v1 = vmax.f32 %v1642_v35, 0.0  ;;  %v4084_v11 = vld [vmem:[%s4376_s4 + $0x110] sm:$0xff]  }
 0x6ee   : > { %v1840_v61 = vmax.f32 %v1601_v46, 0.0  ;;  %v1842_v62 = vmax.f32 %v1644_v48, 0.0  ;;  %3809 = vmatprep.subr.bf16.mxu1 %v4078_v31  ;;  %3831 = vmatprep.subr.bf16.mxu0 %v4079_v32  ;;  %v4085_v12 = vld [vmem:[%s4376_s4 + $0x190] sm:$0xff]   ;;  %v1364_v25 = vrot.slane %v4535_v39, %v1331_v52  ;;  %v1368_v26 = vrot.slane %v4535_v39, %v1335_v55  ;;  %v4090_v52 = vld [vmem:[%s4376_s4 + $0x160] sm:$0xff]  }
 0x6ef   : > { %v1841_v2 = vmax.f32 %v1603_v53, 0.0  ;;  %v1843_v3 = vmax.f32 %v1646_v54, 0.0  ;;  %v1376_v31 = vrot.slane %v4535_v39, %v1343_v56  ;;  %v4091_v55 = vld [vmem:[%s4376_s4 + $0x1e0] sm:$0xff]  }
 0x6f0   : > { %v4574_v5 = vpack.c.bf16 %v1840_v61, %v1824_v59  ;;  %v4576_v6 = vpack.c.bf16 %v1842_v62, %v1826_v60  ;;  %v4093_v53 = vld [vmem:[%s4376_s4 + $0x1a0] sm:$0xff]   ;;  %v4094_v59 = vld [vmem:[%s4376_s4 + $0x168] sm:$0xff]  }
 0x6f1   : > { %v1857_v45 = vpack.c.bf16 %v1841_v2, %v1825_v0  ;;  %v1859_v7 = vpack.c.bf16 %v1843_v3, %v1827_v1  ;;  %3810 = vmatpush3.bf16.msra.mxu1 %v4080_v57  ;;  %3832 = vmatpush3.bf16.msra.mxu0 %v4081_v58  ;;  %v1682_v9 = vpop.f32.mrb[12].mxu1  ;;  %v1725_v10 = vpop.f32.mrb[16].mxu0  ;;  %v4095_v60 = vld [vmem:[%s4376_s4 + $0x1e8] sm:$0xff]  }
 0x6f2   : > { %v1683_v13 = vadd.f32 %v1682_v9, %v1348_v33  ;;  %v1726_v14 = vadd.f32 %v1725_v10, %v1356_v43  ;;  %v1684_v8 = vpop.f32.mrb[13].mxu1  ;;  %v1727_v4 = vpop.f32.mrb[17].mxu0  ;;  %3811 = vmatprep.subr.bf16.mxu1 %v4082_v63  ;;  %3833 = vmatprep.subr.bf16.mxu0 %v4083_v44  ;;  %v4096_v9 = vld [vmem:[%s4376_s4 + $0x128] sm:$0xff]  }
 0x6f3   : > { %v1685_v17 = vadd.f32 %v1684_v8, %v1352_v41  ;;  %v1728_v18 = vadd.f32 %v1727_v4, %v1360_v42  ;;  %v1686_v19 = vpop.f32.mrb[14].mxu1  ;;  %v1729_v20 = vpop.f32.mrb[18].mxu0  ;;  %3013 = vmatprep.mubr.bf16.mxu1 %v1857_v45  ;;  %3054 = vmatprep.mubr.bf16.mxu0 %v1859_v7  ;;  %v4097_v10 = vld [vmem:[%s4376_s4 + $0x1a8] sm:$0xff]   ;;  %v4098_v8 = vld [vmem:[%s4376_s4 + $0x170] sm:$0xff]  }
 0x6f4   : > { %v1687_v21 = vadd.f32 %v1686_v19, %v1348_v33  ;;  %v1730_v22 = vadd.f32 %v1729_v20, %v1356_v43  ;;  %v1688_v23 = vpop.f32.mrb[15].mxu1  ;;  %v1731_v24 = vpop.f32.mrb[19].mxu0  ;;  %v1828_v32 = vmax.f32 %v1683_v13, 0.0  ;;  %v1830_v33 = vmax.f32 %v1726_v14, 0.0 }
 0x6f5   : > { %v1689_v27 = vadd.f32 %v1688_v23, %v1352_v41  ;;  %v1732_v28 = vadd.f32 %v1731_v24, %v1360_v42  ;;  %3812 = vmatpush3.bf16.msra.mxu1 %v4084_v11  ;;  %3834 = vmatpush3.bf16.msra.mxu0 %v4085_v12  ;;  %v1829_v36 = vmax.f32 %v1685_v17, 0.0  ;;  %v1831_v38 = vmax.f32 %v1728_v18, 0.0  ;;  %v4092_v41 = vld [vmem:[%s4376_s4 + $0x120] sm:$0xff]   ;;  %v4101_v23 = vld [vmem:[%s4376_s4 + $0x1b0] sm:$0xff]   ;;  %v4102_v24 = vld [vmem:[%s4376_s4 + $0x178] sm:$0xff]  }
 0x6f6   : > { %v1844_v34 = vmax.f32 %v1687_v21, 0.0  ;;  %v1846_v35 = vmax.f32 %v1730_v22, 0.0  ;;  %3813 = vmatprep.subr.bf16.mxu1 %v4086_v15  ;;  %3835 = vmatprep.subr.bf16.mxu0 %v4087_v16  ;;  %v4100_v22 = vld [vmem:[%s4376_s4 + $0x130] sm:$0xff]  }
 0x6f7   : > { %v1845_v43 = vmax.f32 %v1689_v27, 0.0  ;;  %v1847_v46 = vmax.f32 %v1732_v28, 0.0  ;;  %v4105_v27 = vld [vmem:[%s4376_s4 + $0x1b8] sm:$0xff]   ;;  %v4106_v28 = vld [vmem:[%s4376_s4 + $0x240] sm:$0xff]  }
 0x6f8   : > { %v4595_v48 = vpack.c.bf16 %v1844_v34, %v1828_v32  ;;  %v4597_v37 = vpack.c.bf16 %v1846_v35, %v1830_v33  ;;  %v4110_v32 = vld [vmem:[%s4376_s4 + $0x248] sm:$0xff]  }
 0x6f9   : > { %v4599_v39 = vpack.c.bf16 %v1845_v43, %v1829_v36  ;;  %v4601_v56 = vpack.c.bf16 %v1847_v46, %v1831_v38  ;;  %3814 = vmatpush3.bf16.msra.mxu1 %v4088_v29  ;;  %3836 = vmatpush3.bf16.msra.mxu0 %v4089_v30  ;;  %v1768_v50 = vpop.f32.mrb[16].mxu1  ;;  %v1811_v51 = vpop.f32.mrb[20].mxu0  ;;  %v4107_v29 = vld [vmem:[%s4376_s4 + $0x2c0] sm:$0xff]   ;;  %v4111_v33 = vld [vmem:[%s4376_s4 + $0x2c8] sm:$0xff]   ;;  %v4118_v36 = vld [vmem:[%s4376_s4 + $0x258] sm:$0xff]  }
 0x6fa   : > { %v1769_v54 = vadd.f32 %v1768_v50, %v1364_v25  ;;  %v1812_v57 = vadd.f32 %v1811_v51, %v4538_v40  ;;  %v1770_v58 = vpop.f32.mrb[17].mxu1  ;;  %v1813_v42 = vpop.f32.mrb[21].mxu0  ;;  %3815 = vmatprep.subr.bf16.mxu1 %v4090_v52  ;;  %3837 = vmatprep.subr.bf16.mxu0 %v4091_v55  ;;  %v4108_v30 = vld [vmem:[%s4376_s4 + $0x200] sm:$0xff]   ;;  %v4112_v34 = vld [vmem:[%s4376_s4 + $0x208] sm:$0xff]   ;;  %v4114_v52 = vld [vmem:[%s4376_s4 + $0x250] sm:$0xff]  }
 0x6fb   : > { %v1771_v61 = vadd.f32 %v1770_v58, %v1368_v26  ;;  %v1814_v62 = vadd.f32 %v1813_v42, %v1376_v31  ;;  %v1772_v63 = vpop.f32.mrb[18].mxu1  ;;  %v1815_v44 = vpop.f32.mrb[22].mxu0  ;;  %v4113_v35 = vld [vmem:[%s4376_s4 + $0x288] sm:$0xff]   ;;  %v4117_v55 = vld [vmem:[%s4376_s4 + $0x290] sm:$0xff]   ;;  %v4119_v38 = vld [vmem:[%s4376_s4 + $0x2d8] sm:$0xff]  }
 0x6fc   : > { %v1773_v0 = vadd.f32 %v1772_v63, %v1364_v25  ;;  %v1816_v1 = vadd.f32 %v1815_v44, %v4538_v40  ;;  %v1774_v2 = vpop.f32.mrb[19].mxu1  ;;  %v1817_v3 = vpop.f32.mrb[23].mxu0  ;;  %v1832_v11 = vmax.f32 %v1769_v54, 0.0  ;;  %v1834_v12 = vmax.f32 %v1812_v57, 0.0  ;;  %v4099_v40 = vld [vmem:[%s4376_s4 + $0x1f0] sm:$0xff]   ;;  %v4103_v25 = vld [vmem:[%s4376_s4 + $0x1f8] sm:$0xff]  }
 0x6fd   : > { %v1775_v45 = vadd.f32 %v1774_v2, %v1368_v26  ;;  %v1818_v7 = vadd.f32 %v1817_v3, %v1376_v31  ;;  %3816 = vmatpush3.bf16.msra.mxu1 %v4092_v41  ;;  %3838 = vmatpush3.bf16.msra.mxu0 %v4093_v53  ;;  %v1833_v4 = vmax.f32 %v1771_v61, 0.0  ;;  %v1835_v15 = vmax.f32 %v1814_v62, 0.0  ;;  %v4104_v26 = vld [vmem:[%s4376_s4 + $0x138] sm:$0xff]   ;;  %v4109_v31 = vld [vmem:[%s4376_s4 + $0x280] sm:$0xff]   ;;  %v4126_v41 = vld [vmem:[%s4376_s4 + $0x268] sm:$0xff]  }
 0x6fe   : > { %v1848_v13 = vmax.f32 %v1773_v0, 0.0  ;;  %v1850_v14 = vmax.f32 %v1816_v1, 0.0  ;;  %3817 = vmatprep.subr.bf16.mxu1 %v4094_v59  ;;  %3839 = vmatprep.subr.bf16.mxu0 %v4095_v60  ;;  %v4120_v43 = vld [vmem:[%s4376_s4 + $0x218] sm:$0xff]   ;;  %v4124_v50 = vld [vmem:[%s4376_s4 + $0x220] sm:$0xff]   ;;  %v4127_v53 = vld [vmem:[%s4376_s4 + $0x2e8] sm:$0xff]  }
 0x6ff   : > { %v1849_v16 = vmax.f32 %v1775_v45, 0.0  ;;  %v1851_v17 = vmax.f32 %v1818_v7, 0.0  ;;  %v4121_v46 = vld [vmem:[%s4376_s4 + $0x298] sm:$0xff]   ;;  %v4125_v51 = vld [vmem:[%s4376_s4 + $0x2a0] sm:$0xff]   ;;  %v4128_v54 = vld [vmem:[%s4376_s4 + $0x228] sm:$0xff]  }
 0x700   : > { %v4613_v18 = vpack.c.bf16 %v1848_v13, %v1832_v11  ;;  %v4615_v19 = vpack.c.bf16 %v1850_v14, %v1834_v12  ;;  %v4129_v57 = vld [vmem:[%s4376_s4 + $0x2a8] sm:$0xff]   ;;  %v4130_v58 = vld [vmem:[%s4376_s4 + $0x270] sm:$0xff]   ;;  %v4134_v61 = vld [vmem:[%s4376_s4 + $0x278] sm:$0xff]  }
 0x701   : > { %v4617_v20 = vpack.c.bf16 %v1849_v16, %v1833_v4  ;;  %v4619_v21 = vpack.c.bf16 %v1851_v17, %v1835_v15  ;;  %3818 = vmatpush3.bf16.msra.mxu1 %v4096_v9  ;;  %3840 = vmatpush3.bf16.msra.mxu0 %v4097_v10  ;;  %v4131_v42 = vld [vmem:[%s4376_s4 + $0x2f0] sm:$0xff]   ;;  %v4135_v62 = vld [vmem:[%s4376_s4 + $0x2f8] sm:$0xff]   ;;  %v4138_v0 = vld [vmem:[%s4376_s4 + $0x340] sm:$0xff]  }
 0x702   : > { %3819 = vmatprep.subr.bf16.mxu1 %v4098_v8  ;;  %3841 = vmatprep.subr.bf16.mxu0 %v4099_v40  ;;  %v4132_v59 = vld [vmem:[%s4376_s4 + $0x230] sm:$0xff]   ;;  %v4136_v63 = vld [vmem:[%s4376_s4 + $0x238] sm:$0xff]   ;;  %v4139_v1 = vld [vmem:[%s4376_s4 + $0x3c0] sm:$0xff]  }
 0x703   : > { %v4133_v60 = vld [vmem:[%s4376_s4 + $0x2b0] sm:$0xff]   ;;  %v4137_v44 = vld [vmem:[%s4376_s4 + $0x2b8] sm:$0xff]   ;;  %v4140_v2 = vld [vmem:[%s4376_s4 + $0x300] sm:$0xff]  }
 0x704   : > { %v4141_v3 = vld [vmem:[%s4376_s4 + $0x380] sm:$0xff]   ;;  %v4142_v45 = vld [vmem:[%s4376_s4 + $0x348] sm:$0xff]   ;;  %v4146_v11 = vld [vmem:[%s4376_s4 + $0x350] sm:$0xff]  }
 0x705   : > { %3820 = vmatpush3.bf16.msra.mxu1 %v4100_v22  ;;  %3842 = vmatpush3.bf16.msra.mxu0 %v4101_v23  ;;  %v4143_v7 = vld [vmem:[%s4376_s4 + $0x3c8] sm:$0xff]   ;;  %v4149_v12 = vld [vmem:[%s4376_s4 + $0x390] sm:$0xff]   ;;  %v4150_v13 = vld [vmem:[%s4376_s4 + $0x358] sm:$0xff]  }
 0x706   : > { %3821 = vmatprep.subr.bf16.mxu1 %v4102_v24  ;;  %3843 = vmatprep.subr.bf16.mxu0 %v4103_v25  ;;  %v4144_v9 = vld [vmem:[%s4376_s4 + $0x308] sm:$0xff]   ;;  %v4151_v14 = vld [vmem:[%s4376_s4 + $0x3d8] sm:$0xff]   ;;  %v4154_v4 = vld [vmem:[%s4376_s4 + $0x360] sm:$0xff]  }
 0x707   : > { %v4145_v10 = vld [vmem:[%s4376_s4 + $0x388] sm:$0xff]   ;;  %v4152_v8 = vld [vmem:[%s4376_s4 + $0x318] sm:$0xff]   ;;  %v4155_v15 = vld [vmem:[%s4376_s4 + $0x3e0] sm:$0xff]  }
 0x708   : > { %v4153_v40 = vld [vmem:[%s4376_s4 + $0x398] sm:$0xff]   ;;  %v4156_v16 = vld [vmem:[%s4376_s4 + $0x320] sm:$0xff]   ;;  %v4160_v22 = vld [vmem:[%s4376_s4 + $0x328] sm:$0xff]  }
 0x709   : > { %3822 = vmatpush3.bf16.msra.mxu1 %v4104_v26  ;;  %3844 = vmatpush3.bf16.msra.mxu0 %v4105_v27  ;;  %v4157_v17 = vld [vmem:[%s4376_s4 + $0x3a0] sm:$0xff]   ;;  %v4161_v23 = vld [vmem:[%s4376_s4 + $0x3a8] sm:$0xff]   ;;  %v4162_v24 = vld [vmem:[%s4376_s4 + $0x370] sm:$0xff]  }
 0x70a   : > { %3851 = vmatprep.subr.bf16.mxu1 %v4106_v28  ;;  %3873 = vmatprep.subr.bf16.mxu0 %v4107_v29  ;;  %v4163_v25 = vld [vmem:[%s4376_s4 + $0x3f0] sm:$0xff]   ;;  %v4166_v28 = vld [vmem:[%s4376_s4 + $0x378] sm:$0xff]  }
 0x70b   : > { %v4164_v26 = vld [vmem:[%s4376_s4 + $0x330] sm:$0xff]   ;;  %v4167_v29 = vld [vmem:[%s4376_s4 + $0x3f8] sm:$0xff]  }
 0x70c   : > { %3014 = vmatmul.mubr.bf16.vlgmr.msra.gmra.mrb[24].mxu1 %v4574_v5  ;;  %3055 = vmatmul.mubr.bf16.vlgmr.msra.gmra.mrb[28].mxu0 %v4576_v6  ;;  %v4115_v5 = vld [vmem:[%s4376_s4 + $0x2d0] sm:$0xff]  }
 0x70d   : > { %3852 = vmatpush3.bf16.msra.mxu1 %v4108_v30  ;;  %3095 = vmatprep.mubr.bf16.mxu1 %v4599_v39  ;;  %v4116_v6 = vld [vmem:[%s4376_s4 + $0x210] sm:$0xff]   ;;  %v4122_v39 = vld [vmem:[%s4376_s4 + $0x260] sm:$0xff]   ;;  %v4168_v30 = vld [vmem:[%s4376_s4 + $0x338] sm:$0xff]  }
 0x70e   : > { %3874 = vmatpush3.bf16.msra.mxu0 %v4109_v31  ;;  %3136 = vmatprep.mubr.bf16.mxu0 %v4601_v56  ;;  %v4123_v56 = vld [vmem:[%s4376_s4 + $0x2e0] sm:$0xff]   ;;  %v4165_v27 = vld [vmem:[%s4376_s4 + $0x3b0] sm:$0xff]   ;;  %v4169_v31 = vld [vmem:[%s4376_s4 + $0x3b8] sm:$0xff]  }
 0x70f   : > { %3853 = vmatprep.subr.bf16.mxu1 %v4110_v32  ;;  %3875 = vmatprep.subr.bf16.mxu0 %v4111_v33 }
 0x711   : > { %3854 = vmatpush3.bf16.msra.mxu1 %v4112_v34  ;;  %v3597_v34 = vld [vmem:[%s679_s1] ss:$0 sm:$0xff] }
 0x712   : > { %3876 = vmatpush3.bf16.msra.mxu0 %v4113_v35  ;;  %3855 = vmatprep.subr.bf16.mxu1 %v4114_v52 }
 0x713   : > { %3877 = vmatprep.subr.bf16.mxu0 %v4115_v5 }
 0x715   : > { %3856 = vmatpush3.bf16.msra.mxu1 %v4116_v6 }
 0x716   : > { %3878 = vmatpush3.bf16.msra.mxu0 %v4117_v55  ;;  %3857 = vmatprep.subr.bf16.mxu1 %v4118_v36 }
 0x717   : > { %3879 = vmatprep.subr.bf16.mxu0 %v4119_v38 }
 0x719   : > { %3858 = vmatpush3.bf16.msra.mxu1 %v4120_v43 }
 0x71a   : > { %3880 = vmatpush3.bf16.msra.mxu0 %v4121_v46  ;;  %3859 = vmatprep.subr.bf16.mxu1 %v4122_v39 }
 0x71b   : > { %3881 = vmatprep.subr.bf16.mxu0 %v4123_v56 }
 0x71d   : > { %3860 = vmatpush3.bf16.msra.mxu1 %v4124_v50 }
 0x71e   : > { %3882 = vmatpush3.bf16.msra.mxu0 %v4125_v51  ;;  %3861 = vmatprep.subr.bf16.mxu1 %v4126_v41 }
 0x71f   : > { %3883 = vmatprep.subr.bf16.mxu0 %v4127_v53 }
 0x721   : > { %3862 = vmatpush3.bf16.msra.mxu1 %v4128_v54 }
 0x722   : > { %3884 = vmatpush3.bf16.msra.mxu0 %v4129_v57  ;;  %3863 = vmatprep.subr.bf16.mxu1 %v4130_v58 }
 0x723   : > { %3885 = vmatprep.subr.bf16.mxu0 %v4131_v42 }
 0x725   : > { %3864 = vmatpush3.bf16.msra.mxu1 %v4132_v59 }
 0x726   : > { %3886 = vmatpush3.bf16.msra.mxu0 %v4133_v60  ;;  %3865 = vmatprep.subr.bf16.mxu1 %v4134_v61 }
 0x727   : > { %3887 = vmatprep.subr.bf16.mxu0 %v4135_v62 }
 0x729   : > { %3866 = vmatpush3.bf16.msra.mxu1 %v4136_v63 }
 0x72a   : > { %3888 = vmatpush3.bf16.msra.mxu0 %v4137_v44  ;;  %3895 = vmatprep.subr.bf16.mxu1 %v4138_v0 }
 0x72b   : > { %3917 = vmatprep.subr.bf16.mxu0 %v4139_v1 }
 0x72c   : > { %3096 = vmatmul.mubr.bf16.vlgmr.msra.gmra.mrb[28].mxu1 %v4595_v48  ;;  %v4147_v48 = vld [vmem:[%s4376_s4 + $0x3d0] sm:$0xff]  }
 0x72d   : > { %3137 = vmatmul.mubr.bf16.vlgmr.msra.gmra.mrb[32].mxu0 %v4597_v37  ;;  %3896 = vmatpush3.bf16.msra.mxu1 %v4140_v2  ;;  %v4148_v37 = vld [vmem:[%s4376_s4 + $0x310] sm:$0xff]  }
 0x72e   : > { %3177 = vmatprep.mubr.bf16.mxu1 %v4617_v20  ;;  %3918 = vmatpush3.bf16.msra.mxu0 %v4141_v3  ;;  %v4158_v20 = vld [vmem:[%s4376_s4 + $0x368] sm:$0xff]  }
 0x72f   : > { %3218 = vmatprep.mubr.bf16.mxu0 %v4619_v21  ;;  %3897 = vmatprep.subr.bf16.mxu1 %v4142_v45  ;;  %v4159_v21 = vld [vmem:[%s4376_s4 + $0x3e8] sm:$0xff]  }
 0x730   : > { %3919 = vmatprep.subr.bf16.mxu0 %v4143_v7 }
 0x731   : > { %3898 = vmatpush3.bf16.msra.mxu1 %v4144_v9 }
 0x732   : > { %3920 = vmatpush3.bf16.msra.mxu0 %v4145_v10  ;;  %3899 = vmatprep.subr.bf16.mxu1 %v4146_v11 }
 0x733   : > { %3921 = vmatprep.subr.bf16.mxu0 %v4147_v48 }
 0x735   : > { %3900 = vmatpush3.bf16.msra.mxu1 %v4148_v37 }
 0x736   : > { %3922 = vmatpush3.bf16.msra.mxu0 %v4149_v12  ;;  %3901 = vmatprep.subr.bf16.mxu1 %v4150_v13 }
 0x737   : > { %3923 = vmatprep.subr.bf16.mxu0 %v4151_v14 }
 0x739   : > { %3902 = vmatpush3.bf16.msra.mxu1 %v4152_v8 }
 0x73a   : > { %3924 = vmatpush3.bf16.msra.mxu0 %v4153_v40  ;;  %3903 = vmatprep.subr.bf16.mxu1 %v4154_v4 }
 0x73b   : > { %3925 = vmatprep.subr.bf16.mxu0 %v4155_v15 }
 0x73d   : > { %3904 = vmatpush3.bf16.msra.mxu1 %v4156_v16 }
 0x73e   : > { %3926 = vmatpush3.bf16.msra.mxu0 %v4157_v17  ;;  %3905 = vmatprep.subr.bf16.mxu1 %v4158_v20 }
 0x73f   : > { %3927 = vmatprep.subr.bf16.mxu0 %v4159_v21 }
 0x741   : > { %3906 = vmatpush3.bf16.msra.mxu1 %v4160_v22 }
 0x742   : > { %3928 = vmatpush3.bf16.msra.mxu0 %v4161_v23  ;;  %3907 = vmatprep.subr.bf16.mxu1 %v4162_v24 }
 0x743   : > { %3929 = vmatprep.subr.bf16.mxu0 %v4163_v25 }
 0x745   : > { %3908 = vmatpush3.bf16.msra.mxu1 %v4164_v26 }
 0x746   : > { %3930 = vmatpush3.bf16.msra.mxu0 %v4165_v27  ;;  %3909 = vmatprep.subr.bf16.mxu1 %v4166_v28 }
 0x747   : > { %3931 = vmatprep.subr.bf16.mxu0 %v4167_v29 }
 0x749   : > { %3910 = vmatpush3.bf16.msra.mxu1 %v4168_v30 }
 0x74a   : > { %3932 = vmatpush3.bf16.msra.mxu0 %v4169_v31 }
 0x74c   : > { %3178 = vmatmul.mubr.bf16.vlgmr.msra.gmra.mrb[32].mxu1 %v4613_v18 }
 0x74d   : > { %3219 = vmatmul.mubr.bf16.vlgmr.msra.gmra.mrb[36].mxu0 %v4615_v19 }
 0x7bf   : > { %v3779_v32 = vpop.f32.mrb[20].mxu1  ;;  %v3801_v33 = vpop.f32.mrb[24].mxu0 }
 0x7c0   : > { %v3780_v35 = vpop.f32.mrb[21].mxu1  ;;  %v3802_v52 = vpop.f32.mrb[25].mxu0 }
 0x7c1   : > { %v3781_v5 = vadd.f32 %v3780_v35, %v3779_v32  ;;  %v3803_v6 = vadd.f32 %v3802_v52, %v3801_v33  ;;  %v3782_v55 = vpop.f32.mrb[22].mxu1  ;;  %v3804_v36 = vpop.f32.mrb[26].mxu0 }
 0x7c2   : > { %v3783_v38 = vpop.f32.mrb[23].mxu1  ;;  %v3805_v43 = vpop.f32.mrb[27].mxu0 }
 0x7c3   : > { %v2934_v46 = vadd.f32 %v3781_v5, %v3597_v34  ;;  %v3784_v39 = vadd.f32 %v3783_v38, %v3782_v55  ;;  %v3806_v18 = vadd.f32 %v3805_v43, %v3804_v36 }
 0x7c5   : > { %v2975_v56 = vadd.f32 %v3803_v6, %v2934_v46  ;;  %v2937_v19 = vadd.f32 %v3784_v39, %v3597_v34 }
 0x7c7   : > { %v2978_v50 = vadd.f32 %v3806_v18, %v2937_v19 }
 0x7df   : > { %v3823_v51 = vpop.f32.mrb[24].mxu1  ;;  %v3845_v41 = vpop.f32.mrb[28].mxu0 }
 0x7e0   : > { %v3824_v53 = vpop.f32.mrb[25].mxu1  ;;  %v3846_v54 = vpop.f32.mrb[29].mxu0 }
 0x7e1   : > { %v3825_v57 = vadd.f32 %v3824_v53, %v3823_v51  ;;  %v3847_v58 = vadd.f32 %v3846_v54, %v3845_v41  ;;  %v3826_v42 = vpop.f32.mrb[26].mxu1  ;;  %v3848_v59 = vpop.f32.mrb[30].mxu0 }
 0x7e2   : > { %v3827_v60 = vpop.f32.mrb[27].mxu1  ;;  %v3849_v61 = vpop.f32.mrb[31].mxu0 }
 0x7e3   : > { %v3016_v62 = vadd.f32 %v3825_v57, %v2975_v56  ;;  %v3828_v63 = vadd.f32 %v3827_v60, %v3826_v42  ;;  %v3850_v44 = vadd.f32 %v3849_v61, %v3848_v59  ;;  %v3727_v60 = vld [vmem:[%s685_s18] ss:$0 sm:$0xff] }
 0x7e5   : > { %v3057_v0 = vadd.f32 %v3847_v58, %v3016_v62  ;;  %v3019_v1 = vadd.f32 %v3828_v63, %v2978_v50  ;;  %v3726_v58 = vld [vmem:[%s682_s30] ss:$0 sm:$0xff] }
 0x7e7   : > { %v3060_v2 = vadd.f32 %v3850_v44, %v3019_v1  ;;  %v3279_v1 = vld [vmem:[%s4802_s0] sm:$0xff] (!%p3728_p5) }
 0x7ff   : > { %v3867_v3 = vpop.f32.mrb[28].mxu1 }
 0x800   : > { %v3889_v45 = vpop.f32.mrb[32].mxu0  ;;  %v3868_v7 = vpop.f32.mrb[29].mxu1 }
 0x801   : > { %v3869_v9 = vadd.f32 %v3868_v7, %v3867_v3  ;;  %v3890_v10 = vpop.f32.mrb[33].mxu0  ;;  %v3870_v11 = vpop.f32.mrb[30].mxu1 }
 0x802   : > { %v3891_v48 = vadd.f32 %v3890_v10, %v3889_v45  ;;  %v3892_v37 = vpop.f32.mrb[34].mxu0  ;;  %v3871_v12 = vpop.f32.mrb[31].mxu1  ;;  %v3729_v45 = vld [vmem:[%s4803_s26] ss:$0 sm:$0xff] (!%p3728_p5) }
 0x803   : > { %v3098_v13 = vadd.f32 %v3869_v9, %v3057_v0  ;;  %v3872_v14 = vadd.f32 %v3871_v12, %v3870_v11  ;;  %v3893_v8 = vpop.f32.mrb[35].mxu0 }
 0x804   : > { %v3894_v40 = vadd.f32 %v3893_v8, %v3892_v37 }
 0x805   : > { %v3139_v4 = vadd.f32 %v3891_v48, %v3098_v13  ;;  %v3101_v15 = vadd.f32 %v3872_v14, %v3060_v2  ;;  %v3280_v2 = vld [vmem:[%s4802_s0 + $0x8] sm:$0xff] (!%p3728_p5) }
 0x806   : > { %v4018_v3 = vpack.c.bf16 (!%p3728_p5), %v3280_v2, %v3279_v1 }
 0x807   : > { %v3142_v16 = vadd.f32 %v3894_v40, %v3101_v15 }
 0x808   : > { %4019 = vmatprep.subr.bf16.mxu0 (!%p3728_p5), %v4018_v3 }
 0x809   : > { %4021 = vmatpush3.bf16.msra.mxu0 (!%p3728_p5), %v4018_v3 }
 0x81f   : > { %v3911_v17 = vpop.f32.mrb[32].mxu1 }
 0x820   : > { %v3933_v20 = vpop.f32.mrb[36].mxu0  ;;  %v3912_v21 = vpop.f32.mrb[33].mxu1 }
 0x821   : > { %v3913_v22 = vadd.f32 %v3912_v21, %v3911_v17  ;;  %v3934_v23 = vpop.f32.mrb[37].mxu0  ;;  %v3914_v24 = vpop.f32.mrb[34].mxu1 }
 0x822   : > { %v3935_v25 = vadd.f32 %v3934_v23, %v3933_v20  ;;  %v3936_v26 = vpop.f32.mrb[38].mxu0  ;;  %v3915_v27 = vpop.f32.mrb[35].mxu1 }
 0x823   : > { %v3180_v28 = vadd.f32 %v3913_v22, %v3139_v4  ;;  %v3916_v29 = vadd.f32 %v3915_v27, %v3914_v24  ;;  %v3937_v30 = vpop.f32.mrb[39].mxu0 }
 0x824   : > { %v3938_v31 = vadd.f32 %v3937_v30, %v3936_v26 }
 0x825   : > { %v3221_v32 = vadd.f32 %v3935_v25, %v3180_v28  ;;  %v3183_v33 = vadd.f32 %v3916_v29, %v3142_v16 }
 0x827   : > { %v3224_v34 = vadd.f32 %v3938_v31, %v3183_v33  ;;  %v3227_v35 = vadd.f32 %v3221_v32, %v4472_v49 }
 0x829   : > { %v3231_v52 = vsel %vm707_vm1, %v3227_v35, 0.0  ;;  %v3228_v5 = vadd.f32 %v3224_v34, %v4469_v47 }
 0x82a   : > { %3232 = vadd.xlane.f32.xlu0 %v3231_v52 }
 0x82b   : > { %v3234_v6 = vsel %vm707_vm1, %v3228_v5, 0.0 }
 0x82c   : > { %3235 = vadd.xlane.f32.xlu1 %v3234_v6 }
 0x8b7   : > { %v3233_v55 = vpop.xlane.xlu0 %3232 }
 0x8b8   : > { %v3237_v36 = vmul.f32 0.0625, %v3233_v55 }
 0x8b9   : > { %v3236_v38 = vpop.xlane.xlu1 %3235 }
 0x8ba   : > { %v3239_v43 = vsub.f32 %v3227_v35, %v3237_v36  ;;  %v3238_v46 = vmul.f32 0.0625, %v3236_v38 }
 0x8bc   : > { %v3240_v39 = vsub.f32 %v3228_v5, %v3238_v46  ;;  %v3241_v18 = vmul.f32 %v3239_v43, %v3239_v43 }
 0x8be   : > { %v3243_v56 = vsel %vm707_vm1, %v3241_v18, 0.0  ;;  %v3242_v19 = vmul.f32 %v3240_v39, %v3240_v39 }
 0x8bf   : > { %3244 = vadd.xlane.f32.xlu0 %v3243_v56 }
 0x8c0   : > { %v3246_v49 = vsel %vm707_vm1, %v3242_v19, 0.0 }
 0x8c1   : > { %3247 = vadd.xlane.f32.xlu1 %v3246_v49 }
 0x94c   : > { %v3245_v47 = vpop.xlane.xlu0 %3244 }
 0x94d   : > { %v3249_v50 = vmul.f32 0.0625, %v3245_v47 }
 0x94e   : > { %v3248_v51 = vpop.xlane.xlu1 %3247 }
 0x94f   : > { %v3251_v41 = vadd.f32 1e-05, %v3249_v50  ;;  %v3250_v53 = vmul.f32 0.0625, %v3248_v51 }
 0x951   : > { %4182 = vrsqrt.f32 %v3251_v41  ;;  %v3252_v54 = vadd.f32 1e-05, %v3250_v53 }
 0x953   : > { %4184 = vrsqrt.f32 %v3252_v54 }
 0x95b   : > { %v4183_v57 = vpop.eup %4182 }
 0x95c   : > { %v3255_v42 = vmul.f32 %v4183_v57, %v3239_v43 }
 0x95d   : > { %v4185_v59 = vpop.eup %4184 }
 0x95e   : > { %v3263_v61 = vmul.f32 %v3726_v58, %v3255_v42  ;;  %v3256_v62 = vmul.f32 %v4185_v59, %v3240_v39  ;;  %3278 = sbr.rel (%p3728_p5) target bundleno = 2620 (0xa3c), region = 92 }
 0x960   : > { %v3271_v63 = vadd.f32 %v3727_v60, %v3263_v61  ;;  %v3264_v44 = vmul.f32 %v3726_v58, %v3256_v62 }
 0x962   : > { %3273 = vst.msk [vmem:[#allocation2] sm:$0xff] %vm707_vm1, %v3271_v63  ;;  %v3272_v0 = vadd.f32 %v3727_v60, %v3264_v44  ;;  %3989 = vmatprep.mubr.msk.f32.mxu0 (!%p3728_p5), %vm707_vm1, %v3271_v63 }
 0x964   : > { %3274 = vst.msk [vmem:[#allocation2 + $0x8] sm:$0xff] %vm707_vm1, %v3272_v0  ;;  %3990 = vmatmul.mubr.msk.f32.vlgmr.msra.gmra.mrb[0].mxu0 (!%p3728_p5), %vm707_vm1, %v3272_v0 }
 0xa37   : > { %v3991_v7 = vpop.f32.mrb[0].mxu0 }
 0xa38   : > { %v3366_v9 = vadd.f32 %v3991_v7, %v3729_v45  ;;  %v3360_v10 = vpop.f32.mrb[1].mxu0 }
 0xa39   : > { %v3361_v11 = vadd.f32 %v3729_v45, %v3360_v10 }
 0xa3a   : > { %3371 = vst.msk [vmem:[#allocation3 + $0x8] sm:$0xff] %vm3369_vm3, %v3366_v9 }
 0xa3b   : > { %3370 = vst.msk [vmem:[#allocation3] sm:$0xff] %vm3369_vm3, %v3361_v11 }
 0xa3c PF: > { %p4028_p6 = scmp.eq.s32.totalorder %s4319_s22, 1  ;;  %s4225_s27 = smov [#allocation3]  }
 0xa3d   : > { %s3378_s29 = sshll.u32 %s4225_s27, 4  ;;  %s3379_s29 = int_to_ptr.vmem [resolvable:$true] %s3378_s29 }
 0xa3e   : > { %s4186_s21 = scalar_lea.vmem %s3379_s29, 256  ;;  %p4193_p10 = scmp.lt.s32.totalorder %s3379_s29, %s3379_s29 }
 0xa3f   : > { %p4187_p7 = scmp.ne.s32.totalorder %s3379_s29, %s4186_s21  ;;  %p4194_p11 = scmp.lt.s32.totalorder %s4186_s21, %s4186_s21 }
 0xa41   : > { %p4188_p8 = pnand %p4187_p7, %p4028_p6  ;;  %p4195_p12 = por %p4194_p11, %p4193_p10 }
 0xa43   : > { %p4189_p9 = pneg %p4188_p8 }
 0xa45   : > { %p4196_p13 = pnand %p4195_p12, %p4189_p9 }
 0xa47   : > { %4199 = shalt.err (!%p4196_p13)
}
 0xa48   : > { %s4804_s16 = sld [smem:[#allocation14_spill]] }
 0xa4e   : > { %s4200_s1 = scalar_lea.hbm %s4804_s16, 256 }
 0xa4f   : > { %p4201_p0 = scmp.ne.s32.totalorder %s4804_s16, %s4200_s1  ;;  %p4206_p3 = scmp.lt.u32.totalorder %s4200_s1, %s4804_s16 }
 0xa51   : > { %p4202_p1 = pnand %p4201_p0, %p4028_p6 }
 0xa53   : > { %p4203_p2 = pneg %p4202_p1 }
 0xa55   : > { %p4208_p4 = pnand %p4206_p3, %p4203_p2 }
 0xa57   : > { %4211 = shalt.err (!%p4208_p4)
}
 0xa58   : > { %s4226_s15 = smov 128   ;;  %s4227_s25 = smov 8  }
 0xa59   : > { %4025 = dma.vmem_to_hbm [thread:$0]  (%p4028_p6), %s3379_s29, 256, %s4804_s16, [#allocation4], %s4226_s15, %s4226_s15, %s4227_s25  }
 0xa5a   : > { %4217 = dma.done.wait (%p4028_p6), [#allocation4], 256  }
 0xa5b   : > { %4219 = vsyncadd (%p4028_p6), [#allocation4], 4294967040 }
 0xa5c PF: > { %s4805_s18 = sld [smem:[#allocation6_spill]] }
 0xa62   : > { %s27_s21 = sadd.s32 1, %s4805_s18  }
 0xa63   : > { %p24_p5 = scmp.ge.s32.totalorder %s27_s21, 4  }
 0xa65   :  { %26 = sbr.rel (!%p24_p5) target bundleno = 9 (0x9), region = 156 }
 0xa6c   :  { %3394 = vsyncpa [#allocation4], 1 }
 0xa6d   :  { %3396 = vsyncpa [#allocation4 + $0x1], 1 }

</bundles_post_ra>
